<compile_context>
chip_gen: v7x
topology: tpu7x:2x2x1
jax: 0.10.0
libtpu: 0.0.40
codegen_flags: <defaults>
</compile_context>

<pallas_src>
import functools

import jax
import jax.numpy as jnp
from jax.experimental import pallas as pl
from jax.experimental.pallas import tpu as pltpu


def _round_up(x, m):
    return -(-x // m) * m


def _tpu_vmem_and_cores():
    """Per-TensorCore VMEM capacity and a TC-count heuristic.

    v5e/v6e: 128 MiB VMEM, 1 TC/chip.  v7x: 64 MiB VMEM, 2 TCs/chip.
    Falls back to the conservative (64 MiB, 2) if the query fails.
    """
    try:
        cap = int(pltpu.get_tpu_info().vmem_capacity_bytes)
    except Exception:
        cap = 64 * 1024 * 1024
    n_cores = 2 if cap <= 64 * 1024 * 1024 else 1
    return cap, n_cores


def _choose_tiles(b_pad, d_pad, h_pad, n, budget, n_cores):
    """VMEM-aware (b_blk, t_chunk).

    Per-grid-step working set (weights single-buffered, projection written in
    place into the output block, bf16 x / weights, f32 output):
        2 * t*b*d*2           x   (double-buffered, bf16)
      + 2 * t*b*h*4           out (double-buffered, f32)
      + (d*h + h*h)*2 + h*4   weights (bf16) + bias (f32)
      + 3 * b*h*4             h0 (double-buffered) + h carry scratch
    Shrink t_chunk first (it only amortizes per-step overhead and saturates
    around 32-64); shrink b_blk only if even t_chunk=8 does not fit.
    """
    weights = (d_pad * h_pad + h_pad * h_pad) * 2 + h_pad * 4
    # Prefer one batch block per core: largest b_blk -> shortest serial chain
    # per core; on 2-TC chips split in two so both cores get work.
    nb0 = n_cores if b_pad >= 8 * n_cores else 1
    b_blk = _round_up(-(-b_pad // nb0), 8)
    while True:
        fixed = weights + 3 * b_blk * h_pad * 4
        per_t = b_blk * (2 * d_pad * 2 + 2 * h_pad * 4)
        t_max = (budget - fixed) // per_t if budget > fixed else 0
        if t_max >= 8 or b_blk <= 8:
            break
        b_blk = max(8, (b_blk // 2) // 8 * 8)
    t_chunk = int(max(8, min(64, t_max, _round_up(n, 8))))
    return b_blk, t_chunk


def _rnn_chunk_kernel(h0_ref, x_ref, wih_ref, whh_ref, b_ref, out_ref,
                      h_scratch, *, t_chunk, b_blk):
    """One grid step = one (batch block, time chunk).

    h0_ref : (b_blk, H_pad)  f32     initial hidden state for this batch block
    x_ref  : (t_chunk, b_blk, D_pad) bf16, time-major inputs for this chunk
    wih_ref: (D_pad, H_pad)  bf16
    whh_ref: (H_pad, H_pad)  bf16
    b_ref  : (1, H_pad)      f32
    out_ref: (t_chunk, b_blk, H_pad) f32
    h_scratch: (b_blk, H_pad) f32    hidden state carried across time chunks
    """
    chunk = pl.program_id(1)

    # First time-chunk of this batch block: load the initial hidden state.
    @pl.when(chunk == 0)
    def _():
        h_scratch[...] = h0_ref[...]

    d_pad = x_ref.shape[-1]
    h_pad = out_ref.shape[-1]

    # Hoisted input projection for the whole chunk: one big MXU matmul with
    # M = t_chunk * b_blk rows, written straight into the VMEM-resident output
    # block (consumed and overwritten in place below).  The reshape only
    # collapses leading dims (b_blk is a sublane multiple) -> layout-preserving.
    x_flat = x_ref[...].reshape(t_chunk * b_blk, d_pad)
    proj = jnp.dot(x_flat, wih_ref[...],
                   preferred_element_type=jnp.float32) + b_ref[...]
    out_ref[...] = proj.reshape(t_chunk, b_blk, h_pad)

    whh = whh_ref[...]

    def _step(t, h):
        # h <- tanh(h @ W_hh + (x_t @ W_ih + b));  P[t] lives in out_ref[t].
        h_new = jnp.tanh(
            jnp.dot(h.astype(whh.dtype), whh,
                    preferred_element_type=jnp.float32)
            + out_ref[t])
        out_ref[t] = h_new
        return h_new

    # TODO(synk): for tiny b_blk (small-batch inference), keeping W_hh resident
    # in the MXU staging registers (pltpu.matmul_push_rhs / matmul_acc_lhs /
    # matmul_pop) would remove the per-step weight push from the serial chain.
    if b_blk * h_pad * 4 <= 128 * 1024:
        # h fits comfortably in vregs: carry it as an SSA value, unroll so the
        # LLO scheduler overlaps the W_hh matmul with the previous tanh/store.
        h_final = jax.lax.fori_loop(0, t_chunk, _step, h_scratch[...],
                                    unroll=min(8, t_chunk))
        h_scratch[...] = h_final
    else:
        # Large h would spill if carried unrolled: round-trip via VMEM scratch.
        def _step_scratch(t, carry):
            h_scratch[...] = _step(t, h_scratch[...])
            return carry
        jax.lax.fori_loop(0, t_chunk, _step_scratch, 0,
                          unroll=min(2, t_chunk))


def unidirectional_forward(x_bnd, h0, w_ih, w_hh, b):
    """Forward pass matching Unidirectional.forward(x, include_first=True).

    x_bnd : (B, n, D) f32, h0 : (B, H) f32, w_ih : (D, H), w_hh : (H, H),
    b : (1, H).  Returns (B, n+1, H) f32.
    """
    B, n, D = x_bnd.shape
    H = h0.shape[-1]

    # vreg-friendly padding: lanes -> multiples of 128, batch -> multiple of 8.
    # Zero-padded D/H columns contribute nothing; padded batch/time rows are
    # sliced off at the end.
    B_pad = _round_up(B, 8)
    D_pad = _round_up(D, 128)
    H_pad = _round_up(H, 128)

    vmem_cap, n_cores = _tpu_vmem_and_cores()
    budget = (vmem_cap * 3) // 4  # ~48 MiB on v7x, ~96 MiB on v5e/v6e
    b_blk, t_chunk = _choose_tiles(B_pad, D_pad, H_pad, n, budget, n_cores)
    B_pad = _round_up(B_pad, b_blk)
    n_pad = _round_up(n, t_chunk)
    nb = B_pad // b_blk
    nc = n_pad // t_chunk

    # Time-major, zero-padded operands; matmul operands in bf16 (MXU-native),
    # accumulation / hidden state / bias / output stay f32.
    x_tbd = jnp.transpose(x_bnd, (1, 0, 2))
    x_tbd = jnp.pad(x_tbd, ((0, n_pad - n), (0, B_pad - B), (0, D_pad - D)))
    x_tbd = x_tbd.astype(jnp.bfloat16)
    h0_p = jnp.pad(h0, ((0, B_pad - B), (0, H_pad - H))).astype(jnp.float32)
    w_ih_p = jnp.pad(w_ih, ((0, D_pad - D), (0, H_pad - H))).astype(jnp.bfloat16)
    w_hh_p = jnp.pad(w_hh, ((0, H_pad - H), (0, H_pad - H))).astype(jnp.bfloat16)
    b_p = jnp.pad(b, ((0, 0), (0, H_pad - H))).astype(jnp.float32)

    kernel = functools.partial(_rnn_chunk_kernel, t_chunk=t_chunk, b_blk=b_blk)

    def run(single_buffer_weights):
        # Constant-index weights: single-buffering saves their full VMEM copy.
        w_mode = ({"pipeline_mode": pl.Buffered(1)}
                  if single_buffer_weights else {})
        in_specs = [
            pl.BlockSpec((b_blk, H_pad), lambda bi, ci: (bi, 0)),               # h0
            pl.BlockSpec((t_chunk, b_blk, D_pad), lambda bi, ci: (ci, bi, 0)),  # x
            pl.BlockSpec((D_pad, H_pad), lambda bi, ci: (0, 0), **w_mode),      # W_ih
            pl.BlockSpec((H_pad, H_pad), lambda bi, ci: (0, 0), **w_mode),      # W_hh
            pl.BlockSpec((1, H_pad), lambda bi, ci: (0, 0), **w_mode),          # bias
        ]
        return pl.pallas_call(
            kernel,
            # Extra t_chunk rows in front so chunk ci lands at block ci+1;
            # row t_chunk-1 receives h0 (include_first) below, avoiding a
            # full-output concatenate pass through HBM.
            out_shape=jax.ShapeDtypeStruct((n_pad + t_chunk, B_pad, H_pad),
                                           jnp.float32),
            grid_spec=pltpu.PrefetchScalarGridSpec(
                num_scalar_prefetch=0,
                grid=(nb, nc),
                in_specs=in_specs,
                out_specs=pl.BlockSpec((t_chunk, b_blk, H_pad),
                                       lambda bi, ci: (ci + 1, bi, 0)),
                scratch_shapes=[pltpu.VMEM((b_blk, H_pad), jnp.float32)],
            ),
            compiler_params=pltpu.CompilerParams(
                # batch blocks independent -> parallel (megacore on v7x);
                # time chunks are a true recurrence -> arbitrary (sequential,
                # innermost axis; h carried in VMEM scratch).
                dimension_semantics=("parallel", "arbitrary"),
                vmem_limit_bytes=int(budget),
            ),
        )(h0_p, x_tbd, w_ih_p, w_hh_p, b_p)

    try:
        out_big = run(True)
    except Exception:
        out_big = run(False)  # fallback if pipeline_mode=Buffered(1) rejected

    # include_first=True: drop h0 into the row just before the first chunk,
    # then slice out the (n+1)-step window and unpad.
    out_big = out_big.at[t_chunk - 1].set(h0_p)
    out_tbh = out_big[t_chunk - 1: t_chunk + n]            # (n+1, B_pad, H_pad)
    return jnp.transpose(out_tbh, (1, 0, 2))[:B, :, :H]    # (B, n+1, H)


def _reference_forward(x_bnd, h0, w_ih, w_hh, b):
    """Pure-JAX f32 reference replicating Unidirectional.State.forward."""
    def step(h, x_t):
        h_new = jnp.tanh(x_t @ w_ih + h @ w_hh + b)
        return h_new, h_new

    x_tbd = jnp.transpose(x_bnd, (1, 0, 2))
    _, hs = jax.lax.scan(step, h0, x_tbd)          # (n, B, H)
    out = jnp.concatenate([h0[None], hs], axis=0)  # include_first -> (n+1,B,H)
    return jnp.transpose(out, (1, 0, 2))


if __name__ == "__main__":
    B, n, D, H = 2, 8, 16, 32

    key = jax.random.PRNGKey(0)
    k_x, k_h0, k_wih, k_whh, k_b = jax.random.split(key, 5)

    x = jax.random.normal(k_x, (B, n, D), dtype=jnp.float32)
    h0_param = 0.1 * jax.random.normal(k_h0, (1, H), dtype=jnp.float32)
    h0 = jnp.broadcast_to(h0_param, (B, H))        # initial_state(batch_size)
    w_ih = 0.1 * jax.random.normal(k_wih, (D, H), dtype=jnp.float32)
    w_hh = 0.1 * jax.random.normal(k_whh, (H, H), dtype=jnp.float32)
    b = 0.1 * jax.random.normal(k_b, (1, H), dtype=jnp.float32)

    out = unidirectional_forward(x, h0, w_ih, w_hh, b)
    out = jax.block_until_ready(out)

    ref = _reference_forward(x, h0, w_ih, w_hh, b)
    assert out.shape == (B, n + 1, H), out.shape
    # bf16 matmul operands -> looser tolerance vs the f32 reference.
    assert jnp.allclose(out, ref, atol=3e-2, rtol=3e-2), "mismatch vs reference"

    # TODO(synk): return_state / extra_outputs / State-object plumbing of the
    # abstract API are Python-level control flow with no tensor-kernel
    # equivalent; only the include_first=True tensor path is implemented.

    print("KERNEL_OK")
</pallas_src>

<mosaic_0001>
module attributes {stable_mosaic.version = 11 : i64} {
  func.func @_rnn_chunk_kernel(%arg0: i32, %arg1: i32, %arg2: memref<8x128xf32, #tpu.memory_space<vmem>>, %arg3: memref<8x8x128xbf16, #tpu.memory_space<vmem>>, %arg4: memref<128x128xbf16, #tpu.memory_space<vmem>>, %arg5: memref<128x128xbf16, #tpu.memory_space<vmem>>, %arg6: memref<1x128xf32, #tpu.memory_space<vmem>>, %arg7: memref<8x8x128xf32, #tpu.memory_space<vmem>>, %arg8: memref<8x128xf32, #tpu.memory_space<vmem>>) attributes {dimension_semantics = [#tpu.dimension_semantics<parallel>, #tpu.dimension_semantics<arbitrary>], iteration_bounds = array<i64: 1, 1>, scalar_prefetch = 0 : i64, scratch_operands = 1 : i64, tpu.core_type = #tpu.core_type<tc>, window_params = [{transform_indices = @transform_0, window_bounds = array<i64: 8, 128>}, {transform_indices = @transform_1, window_bounds = array<i64: 8, 8, 128>}, {pipeline_mode = #tpu.pipeline_mode<synchronous>, transform_indices = @transform_2, window_bounds = array<i64: 128, 128>}, {pipeline_mode = #tpu.pipeline_mode<synchronous>, transform_indices = @transform_3, window_bounds = array<i64: 128, 128>}, {pipeline_mode = #tpu.pipeline_mode<synchronous>, transform_indices = @transform_4, window_bounds = array<i64: 1, 128>}, {transform_indices = @transform_5, window_bounds = array<i64: 8, 8, 128>}]} {
    %c0_i32 = arith.constant 0 : i32
    %0 = arith.cmpi eq, %arg1, %c0_i32 : i32
    %1 = arith.extui %0 : i1 to i32
    %c0_i32_0 = arith.constant 0 : i32
    %2 = arith.cmpi ne, %1, %c0_i32_0 : i32
    scf.if %2 {
      %c0_57 = arith.constant 0 : index
      %c0_58 = arith.constant 0 : index
      %103 = vector.load %arg2[%c0_57, %c0_58] : memref<8x128xf32, #tpu.memory_space<vmem>>, vector<8x128xf32>
      %c0_59 = arith.constant 0 : index
      %c0_60 = arith.constant 0 : index
      %104 = vector.load %arg8[%c0_59, %c0_60] : memref<8x128xf32, #tpu.memory_space<vmem>>, vector<8x128xf32>
      tpu.vector_store %arg8[%c0_59, %c0_60], %103 {strides = array<i32>} : memref<8x128xf32, #tpu.memory_space<vmem>>, vector<8x128xf32>,
    } else {
    }
    %c0 = arith.constant 0 : index
    %c0_1 = arith.constant 0 : index
    %c0_2 = arith.constant 0 : index
    %3 = vector.load %arg3[%c0, %c0_1, %c0_2] : memref<8x8x128xbf16, #tpu.memory_space<vmem>>, vector<8x8x128xbf16>
    %4 = vector.shape_cast %3 : vector<8x8x128xbf16> to vector<64x128xbf16>
    %c0_3 = arith.constant 0 : index
    %c0_4 = arith.constant 0 : index
    %5 = vector.load %arg4[%c0_3, %c0_4] : memref<128x128xbf16, #tpu.memory_space<vmem>>, vector<128x128xbf16>
    %cst = arith.constant dense<0.000000e+00> : vector<64x128xf32>
    %6 = tpu.matmul %4, %5, %cst {dimension_numbers = #tpu.dot_dimension_numbers<[1], [0], [0], [1], [0, 0, 1, 1], [], []>} : vector<64x128xbf16>, vector<128x128xbf16>, vector<64x128xf32> -> vector<64x128xf32>
    %c0_5 = arith.constant 0 : index
    %c0_6 = arith.constant 0 : index
    %7 = vector.load %arg6[%c0_5, %c0_6] : memref<1x128xf32, #tpu.memory_space<vmem>>, vector<1x128xf32>
    %8 = vector.broadcast %7 : vector<1x128xf32> to vector<64x128xf32>
    %9 = arith.addf %6, %8 : vector<64x128xf32>
    %10 = vector.shape_cast %9 : vector<64x128xf32> to vector<8x8x128xf32>
    %c0_7 = arith.constant 0 : index
    %c0_8 = arith.constant 0 : index
    %c0_9 = arith.constant 0 : index
    %11 = vector.load %arg7[%c0_7, %c0_8, %c0_9] : memref<8x8x128xf32, #tpu.memory_space<vmem>>, vector<8x8x128xf32>
    tpu.vector_store %arg7[%c0_7, %c0_8, %c0_9], %10 {strides = array<i32>} : memref<8x8x128xf32, #tpu.memory_space<vmem>>, vector<8x8x128xf32>,
    %c0_10 = arith.constant 0 : index
    %c0_11 = arith.constant 0 : index
    %12 = vector.load %arg5[%c0_10, %c0_11] : memref<128x128xbf16, #tpu.memory_space<vmem>>, vector<128x128xbf16>
    %c0_12 = arith.constant 0 : index
    %c0_13 = arith.constant 0 : index
    %13 = vector.load %arg8[%c0_12, %c0_13] : memref<8x128xf32, #tpu.memory_space<vmem>>, vector<8x128xf32>
    %c0_i32_14 = arith.constant 0 : i32
    %14 = arith.truncf %13 : vector<8x128xf32> to vector<8x128xbf16>
    %cst_15 = arith.constant dense<0.000000e+00> : vector<8x128xf32>
    %15 = tpu.matmul %14, %12, %cst_15 {dimension_numbers = #tpu.dot_dimension_numbers<[1], [0], [0], [1], [0, 0, 1, 1], [], []>} : vector<8x128xbf16>, vector<128x128xbf16>, vector<8x128xf32> -> vector<8x128xf32>
    %16 = arith.index_cast %c0_i32_14 : i32 to index
    %c0_16 = arith.constant 0 : index
    %c0_17 = arith.constant 0 : index
    %17 = vector.load %arg7[%16, %c0_16, %c0_17] : memref<8x8x128xf32, #tpu.memory_space<vmem>>, vector<1x8x128xf32>
    %18 = vector.shape_cast %17 : vector<1x8x128xf32> to vector<8x128xf32>
    %19 = arith.addf %15, %18 : vector<8x128xf32>
    %20 = math.tanh %19 : vector<8x128xf32>
    %21 = arith.index_cast %c0_i32_14 : i32 to index
    %c0_18 = arith.constant 0 : index
    %c0_19 = arith.constant 0 : index
    %22 = vector.load %arg7[%21, %c0_18, %c0_19] : memref<8x8x128xf32, #tpu.memory_space<vmem>>, vector<1x8x128xf32>
    %23 = vector.shape_cast %22 : vector<1x8x128xf32> to vector<8x128xf32>
    %24 = vector.shape_cast %20 : vector<8x128xf32> to vector<1x8x128xf32>
    tpu.vector_store %arg7[%21, %c0_18, %c0_19], %24 {strides = array<i32>} : memref<8x8x128xf32, #tpu.memory_space<vmem>>, vector<1x8x128xf32>,
    %c1_i32 = arith.constant 1 : i32
    %25 = arith.truncf %20 : vector<8x128xf32> to vector<8x128xbf16>
    %cst_20 = arith.constant dense<0.000000e+00> : vector<8x128xf32>
    %26 = tpu.matmul %25, %12, %cst_20 {dimension_numbers = #tpu.dot_dimension_numbers<[1], [0], [0], [1], [0, 0, 1, 1], [], []>} : vector<8x128xbf16>, vector<128x128xbf16>, vector<8x128xf32> -> vector<8x128xf32>
    %27 = arith.index_cast %c1_i32 : i32 to index
    %c0_21 = arith.constant 0 : index
    %c0_22 = arith.constant 0 : index
    %28 = vector.load %arg7[%27, %c0_21, %c0_22] : memref<8x8x128xf32, #tpu.memory_space<vmem>>, vector<1x8x128xf32>
    %29 = vector.shape_cast %28 : vector<1x8x128xf32> to vector<8x128xf32>
    %30 = arith.addf %26, %29 : vector<8x128xf32>
    %31 = math.tanh %30 : vector<8x128xf32>
    %32 = arith.index_cast %c1_i32 : i32 to index
    %c0_23 = arith.constant 0 : index
    %c0_24 = arith.constant 0 : index
    %33 = vector.load %arg7[%32, %c0_23, %c0_24] : memref<8x8x128xf32, #tpu.memory_space<vmem>>, vector<1x8x128xf32>
    %34 = vector.shape_cast %33 : vector<1x8x128xf32> to vector<8x128xf32>
    %35 = vector.shape_cast %31 : vector<8x128xf32> to vector<1x8x128xf32>
    tpu.vector_store %arg7[%32, %c0_23, %c0_24], %35 {strides = array<i32>} : memref<8x8x128xf32, #tpu.memory_space<vmem>>, vector<1x8x128xf32>,
    %c2_i32 = arith.constant 2 : i32
    %36 = arith.truncf %31 : vector<8x128xf32> to vector<8x128xbf16>
    %cst_25 = arith.constant dense<0.000000e+00> : vector<8x128xf32>
    %37 = tpu.matmul %36, %12, %cst_25 {dimension_numbers = #tpu.dot_dimension_numbers<[1], [0], [0], [1], [0, 0, 1, 1], [], []>} : vector<8x128xbf16>, vector<128x128xbf16>, vector<8x128xf32> -> vector<8x128xf32>
    %38 = arith.index_cast %c2_i32 : i32 to index
    %c0_26 = arith.constant 0 : index
    %c0_27 = arith.constant 0 : index
    %39 = vector.load %arg7[%38, %c0_26, %c0_27] : memref<8x8x128xf32, #tpu.memory_space<vmem>>, vector<1x8x128xf32>
    %40 = vector.shape_cast %39 : vector<1x8x128xf32> to vector<8x128xf32>
    %41 = arith.addf %37, %40 : vector<8x128xf32>
    %42 = math.tanh %41 : vector<8x128xf32>
    %43 = arith.index_cast %c2_i32 : i32 to index
    %c0_28 = arith.constant 0 : index
    %c0_29 = arith.constant 0 : index
    %44 = vector.load %arg7[%43, %c0_28, %c0_29] : memref<8x8x128xf32, #tpu.memory_space<vmem>>, vector<1x8x128xf32>
    %45 = vector.shape_cast %44 : vector<1x8x128xf32> to vector<8x128xf32>
    %46 = vector.shape_cast %42 : vector<8x128xf32> to vector<1x8x128xf32>
    tpu.vector_store %arg7[%43, %c0_28, %c0_29], %46 {strides = array<i32>} : memref<8x8x128xf32, #tpu.memory_space<vmem>>, vector<1x8x128xf32>,
    %c3_i32 = arith.constant 3 : i32
    %47 = arith.truncf %42 : vector<8x128xf32> to vector<8x128xbf16>
    %cst_30 = arith.constant dense<0.000000e+00> : vector<8x128xf32>
    %48 = tpu.matmul %47, %12, %cst_30 {dimension_numbers = #tpu.dot_dimension_numbers<[1], [0], [0], [1], [0, 0, 1, 1], [], []>} : vector<8x128xbf16>, vector<128x128xbf16>, vector<8x128xf32> -> vector<8x128xf32>
    %49 = arith.index_cast %c3_i32 : i32 to index
    %c0_31 = arith.constant 0 : index
    %c0_32 = arith.constant 0 : index
    %50 = vector.load %arg7[%49, %c0_31, %c0_32] : memref<8x8x128xf32, #tpu.memory_space<vmem>>, vector<1x8x128xf32>
    %51 = vector.shape_cast %50 : vector<1x8x128xf32> to vector<8x128xf32>
    %52 = arith.addf %48, %51 : vector<8x128xf32>
    %53 = math.tanh %52 : vector<8x128xf32>
    %54 = arith.index_cast %c3_i32 : i32 to index
    %c0_33 = arith.constant 0 : index
    %c0_34 = arith.constant 0 : index
    %55 = vector.load %arg7[%54, %c0_33, %c0_34] : memref<8x8x128xf32, #tpu.memory_space<vmem>>, vector<1x8x128xf32>
    %56 = vector.shape_cast %55 : vector<1x8x128xf32> to vector<8x128xf32>
    %57 = vector.shape_cast %53 : vector<8x128xf32> to vector<1x8x128xf32>
    tpu.vector_store %arg7[%54, %c0_33, %c0_34], %57 {strides = array<i32>} : memref<8x8x128xf32, #tpu.memory_space<vmem>>, vector<1x8x128xf32>,
    %c4_i32 = arith.constant 4 : i32
    %58 = arith.truncf %53 : vector<8x128xf32> to vector<8x128xbf16>
    %cst_35 = arith.constant dense<0.000000e+00> : vector<8x128xf32>
    %59 = tpu.matmul %58, %12, %cst_35 {dimension_numbers = #tpu.dot_dimension_numbers<[1], [0], [0], [1], [0, 0, 1, 1], [], []>} : vector<8x128xbf16>, vector<128x128xbf16>, vector<8x128xf32> -> vector<8x128xf32>
    %60 = arith.index_cast %c4_i32 : i32 to index
    %c0_36 = arith.constant 0 : index
    %c0_37 = arith.constant 0 : index
    %61 = vector.load %arg7[%60, %c0_36, %c0_37] : memref<8x8x128xf32, #tpu.memory_space<vmem>>, vector<1x8x128xf32>
    %62 = vector.shape_cast %61 : vector<1x8x128xf32> to vector<8x128xf32>
    %63 = arith.addf %59, %62 : vector<8x128xf32>
    %64 = math.tanh %63 : vector<8x128xf32>
    %65 = arith.index_cast %c4_i32 : i32 to index
    %c0_38 = arith.constant 0 : index
    %c0_39 = arith.constant 0 : index
    %66 = vector.load %arg7[%65, %c0_38, %c0_39] : memref<8x8x128xf32, #tpu.memory_space<vmem>>, vector<1x8x128xf32>
    %67 = vector.shape_cast %66 : vector<1x8x128xf32> to vector<8x128xf32>
    %68 = vector.shape_cast %64 : vector<8x128xf32> to vector<1x8x128xf32>
    tpu.vector_store %arg7[%65, %c0_38, %c0_39], %68 {strides = array<i32>} : memref<8x8x128xf32, #tpu.memory_space<vmem>>, vector<1x8x128xf32>,
    %c5_i32 = arith.constant 5 : i32
    %69 = arith.truncf %64 : vector<8x128xf32> to vector<8x128xbf16>
    %cst_40 = arith.constant dense<0.000000e+00> : vector<8x128xf32>
    %70 = tpu.matmul %69, %12, %cst_40 {dimension_numbers = #tpu.dot_dimension_numbers<[1], [0], [0], [1], [0, 0, 1, 1], [], []>} : vector<8x128xbf16>, vector<128x128xbf16>, vector<8x128xf32> -> vector<8x128xf32>
    %71 = arith.index_cast %c5_i32 : i32 to index
    %c0_41 = arith.constant 0 : index
    %c0_42 = arith.constant 0 : index
    %72 = vector.load %arg7[%71, %c0_41, %c0_42] : memref<8x8x128xf32, #tpu.memory_space<vmem>>, vector<1x8x128xf32>
    %73 = vector.shape_cast %72 : vector<1x8x128xf32> to vector<8x128xf32>
    %74 = arith.addf %70, %73 : vector<8x128xf32>
    %75 = math.tanh %74 : vector<8x128xf32>
    %76 = arith.index_cast %c5_i32 : i32 to index
    %c0_43 = arith.constant 0 : index
    %c0_44 = arith.constant 0 : index
    %77 = vector.load %arg7[%76, %c0_43, %c0_44] : memref<8x8x128xf32, #tpu.memory_space<vmem>>, vector<1x8x128xf32>
    %78 = vector.shape_cast %77 : vector<1x8x128xf32> to vector<8x128xf32>
    %79 = vector.shape_cast %75 : vector<8x128xf32> to vector<1x8x128xf32>
    tpu.vector_store %arg7[%76, %c0_43, %c0_44], %79 {strides = array<i32>} : memref<8x8x128xf32, #tpu.memory_space<vmem>>, vector<1x8x128xf32>,
    %c6_i32 = arith.constant 6 : i32
    %80 = arith.truncf %75 : vector<8x128xf32> to vector<8x128xbf16>
    %cst_45 = arith.constant dense<0.000000e+00> : vector<8x128xf32>
    %81 = tpu.matmul %80, %12, %cst_45 {dimension_numbers = #tpu.dot_dimension_numbers<[1], [0], [0], [1], [0, 0, 1, 1], [], []>} : vector<8x128xbf16>, vector<128x128xbf16>, vector<8x128xf32> -> vector<8x128xf32>
    %82 = arith.index_cast %c6_i32 : i32 to index
    %c0_46 = arith.constant 0 : index
    %c0_47 = arith.constant 0 : index
    %83 = vector.load %arg7[%82, %c0_46, %c0_47] : memref<8x8x128xf32, #tpu.memory_space<vmem>>, vector<1x8x128xf32>
    %84 = vector.shape_cast %83 : vector<1x8x128xf32> to vector<8x128xf32>
    %85 = arith.addf %81, %84 : vector<8x128xf32>
    %86 = math.tanh %85 : vector<8x128xf32>
    %87 = arith.index_cast %c6_i32 : i32 to index
    %c0_48 = arith.constant 0 : index
    %c0_49 = arith.constant 0 : index
    %88 = vector.load %arg7[%87, %c0_48, %c0_49] : memref<8x8x128xf32, #tpu.memory_space<vmem>>, vector<1x8x128xf32>
    %89 = vector.shape_cast %88 : vector<1x8x128xf32> to vector<8x128xf32>
    %90 = vector.shape_cast %86 : vector<8x128xf32> to vector<1x8x128xf32>
    tpu.vector_store %arg7[%87, %c0_48, %c0_49], %90 {strides = array<i32>} : memref<8x8x128xf32, #tpu.memory_space<vmem>>, vector<1x8x128xf32>,
    %c7_i32 = arith.constant 7 : i32
    %91 = arith.truncf %86 : vector<8x128xf32> to vector<8x128xbf16>
    %cst_50 = arith.constant dense<0.000000e+00> : vector<8x128xf32>
    %92 = tpu.matmul %91, %12, %cst_50 {dimension_numbers = #tpu.dot_dimension_numbers<[1], [0], [0], [1], [0, 0, 1, 1], [], []>} : vector<8x128xbf16>, vector<128x128xbf16>, vector<8x128xf32> -> vector<8x128xf32>
    %93 = arith.index_cast %c7_i32 : i32 to index
    %c0_51 = arith.constant 0 : index
    %c0_52 = arith.constant 0 : index
    %94 = vector.load %arg7[%93, %c0_51, %c0_52] : memref<8x8x128xf32, #tpu.memory_space<vmem>>, vector<1x8x128xf32>
    %95 = vector.shape_cast %94 : vector<1x8x128xf32> to vector<8x128xf32>
    %96 = arith.addf %92, %95 : vector<8x128xf32>
    %97 = math.tanh %96 : vector<8x128xf32>
    %98 = arith.index_cast %c7_i32 : i32 to index
    %c0_53 = arith.constant 0 : index
    %c0_54 = arith.constant 0 : index
    %99 = vector.load %arg7[%98, %c0_53, %c0_54] : memref<8x8x128xf32, #tpu.memory_space<vmem>>, vector<1x8x128xf32>
    %100 = vector.shape_cast %99 : vector<1x8x128xf32> to vector<8x128xf32>
    %101 = vector.shape_cast %97 : vector<8x128xf32> to vector<1x8x128xf32>
    tpu.vector_store %arg7[%98, %c0_53, %c0_54], %101 {strides = array<i32>} : memref<8x8x128xf32, #tpu.memory_space<vmem>>, vector<1x8x128xf32>,
    %c8_i32 = arith.constant 8 : i32
    %c0_55 = arith.constant 0 : index
    %c0_56 = arith.constant 0 : index
    %102 = vector.load %arg8[%c0_55, %c0_56] : memref<8x128xf32, #tpu.memory_space<vmem>>, vector<8x128xf32>
    tpu.vector_store %arg8[%c0_55, %c0_56], %97 {strides = array<i32>} : memref<8x128xf32, #tpu.memory_space<vmem>>, vector<8x128xf32>,
    return
  }
  func.func @transform_0(%arg0: i32, %arg1: i32) -> (i32, i32) {
    %c0_i32 = arith.constant 0 : i32
    %c0_i32_0 = arith.constant 0 : i32
    return %arg0, %c0_i32 : i32, i32
  }
  func.func @transform_1(%arg0: i32, %arg1: i32) -> (i32, i32, i32) {
    %c0_i32 = arith.constant 0 : i32
    %c0_i32_0 = arith.constant 0 : i32
    return %arg1, %arg0, %c0_i32 : i32, i32, i32
  }
  func.func @transform_2(%arg0: i32, %arg1: i32) -> (i32, i32) {
    %c0_i32 = arith.constant 0 : i32
    %c0_i32_0 = arith.constant 0 : i32
    %c0_i32_1 = arith.constant 0 : i32
    return %c0_i32, %c0_i32_0 : i32, i32
  }
  func.func @transform_3(%arg0: i32, %arg1: i32) -> (i32, i32) {
    %c0_i32 = arith.constant 0 : i32
    %c0_i32_0 = arith.constant 0 : i32
    %c0_i32_1 = arith.constant 0 : i32
    return %c0_i32, %c0_i32_0 : i32, i32
  }
  func.func @transform_4(%arg0: i32, %arg1: i32) -> (i32, i32) {
    %c0_i32 = arith.constant 0 : i32
    %c0_i32_0 = arith.constant 0 : i32
    %c0_i32_1 = arith.constant 0 : i32
    return %c0_i32, %c0_i32_0 : i32, i32
  }
  func.func @transform_5(%arg0: i32, %arg1: i32) -> (i32, i32, i32) {
    %c1_i32 = arith.constant 1 : i32
    %0 = arith.addi %arg1, %c1_i32 : i32
    %c0_i32 = arith.constant 0 : i32
    %c0_i32_0 = arith.constant 0 : i32
    return %0, %arg0, %c0_i32 : i32, i32, i32
  }
}

module attributes {stable_mosaic.version = 11 : i64} {
  func.func @_rnn_chunk_kernel(%arg0: i32, %arg1: i32, %arg2: memref<8x128xf32, #tpu.memory_space<vmem>>, %arg3: memref<8x8x128xbf16, #tpu.memory_space<vmem>>, %arg4: memref<128x128xbf16, #tpu.memory_space<vmem>>, %arg5: memref<128x128xbf16, #tpu.memory_space<vmem>>, %arg6: memref<1x128xf32, #tpu.memory_space<vmem>>, %arg7: memref<8x8x128xf32, #tpu.memory_space<vmem>>, %arg8: memref<8x128xf32, #tpu.memory_space<vmem>>) attributes {dimension_semantics = [#tpu.dimension_semantics<parallel>, #tpu.dimension_semantics<arbitrary>], iteration_bounds = array<i64: 1, 1>, scalar_prefetch = 0 : i64, scratch_operands = 1 : i64, tpu.core_type = #tpu.core_type<tc>, window_params = [{transform_indices = @transform_0, window_bounds = array<i64: 8, 128>}, {transform_indices = @transform_1, window_bounds = array<i64: 8, 8, 128>}, {pipeline_mode = #tpu.pipeline_mode<synchronous>, transform_indices = @transform_2, window_bounds = array<i64: 128, 128>}, {pipeline_mode = #tpu.pipeline_mode<synchronous>, transform_indices = @transform_3, window_bounds = array<i64: 128, 128>}, {pipeline_mode = #tpu.pipeline_mode<synchronous>, transform_indices = @transform_4, window_bounds = array<i64: 1, 128>}, {transform_indices = @transform_5, window_bounds = array<i64: 8, 8, 128>}]} {
    %c0_i32 = arith.constant 0 : i32
    %0 = arith.cmpi eq, %arg1, %c0_i32 : i32
    %1 = arith.extui %0 : i1 to i32
    %c0_i32_0 = arith.constant 0 : i32
    %2 = arith.cmpi ne, %1, %c0_i32_0 : i32
    scf.if %2 {
      %c0_57 = arith.constant 0 : index
      %c0_58 = arith.constant 0 : index
      %103 = vector.load %arg2[%c0_57, %c0_58] : memref<8x128xf32, #tpu.memory_space<vmem>>, vector<8x128xf32>
      %c0_59 = arith.constant 0 : index
      %c0_60 = arith.constant 0 : index
      %104 = vector.load %arg8[%c0_59, %c0_60] : memref<8x128xf32, #tpu.memory_space<vmem>>, vector<8x128xf32>
      tpu.vector_store %arg8[%c0_59, %c0_60], %103 {strides = array<i32>} : memref<8x128xf32, #tpu.memory_space<vmem>>, vector<8x128xf32>,
    } else {
    }
    %c0 = arith.constant 0 : index
    %c0_1 = arith.constant 0 : index
    %c0_2 = arith.constant 0 : index
    %3 = vector.load %arg3[%c0, %c0_1, %c0_2] : memref<8x8x128xbf16, #tpu.memory_space<vmem>>, vector<8x8x128xbf16>
    %4 = vector.shape_cast %3 : vector<8x8x128xbf16> to vector<64x128xbf16>
    %c0_3 = arith.constant 0 : index
    %c0_4 = arith.constant 0 : index
    %5 = vector.load %arg4[%c0_3, %c0_4] : memref<128x128xbf16, #tpu.memory_space<vmem>>, vector<128x128xbf16>
    %cst = arith.constant dense<0.000000e+00> : vector<64x128xf32>
    %6 = tpu.matmul %4, %5, %cst {dimension_numbers = #tpu.dot_dimension_numbers<[1], [0], [0], [1], [0, 0, 1, 1], [], []>} : vector<64x128xbf16>, vector<128x128xbf16>, vector<64x128xf32> -> vector<64x128xf32>
    %c0_5 = arith.constant 0 : index
    %c0_6 = arith.constant 0 : index
    %7 = vector.load %arg6[%c0_5, %c0_6] : memref<1x128xf32, #tpu.memory_space<vmem>>, vector<1x128xf32>
    %8 = vector.broadcast %7 : vector<1x128xf32> to vector<64x128xf32>
    %9 = arith.addf %6, %8 : vector<64x128xf32>
    %10 = vector.shape_cast %9 : vector<64x128xf32> to vector<8x8x128xf32>
    %c0_7 = arith.constant 0 : index
    %c0_8 = arith.constant 0 : index
    %c0_9 = arith.constant 0 : index
    %11 = vector.load %arg7[%c0_7, %c0_8, %c0_9] : memref<8x8x128xf32, #tpu.memory_space<vmem>>, vector<8x8x128xf32>
    tpu.vector_store %arg7[%c0_7, %c0_8, %c0_9], %10 {strides = array<i32>} : memref<8x8x128xf32, #tpu.memory_space<vmem>>, vector<8x8x128xf32>,
    %c0_10 = arith.constant 0 : index
    %c0_11 = arith.constant 0 : index
    %12 = vector.load %arg5[%c0_10, %c0_11] : memref<128x128xbf16, #tpu.memory_space<vmem>>, vector<128x128xbf16>
    %c0_12 = arith.constant 0 : index
    %c0_13 = arith.constant 0 : index
    %13 = vector.load %arg8[%c0_12, %c0_13] : memref<8x128xf32, #tpu.memory_space<vmem>>, vector<8x128xf32>
    %c0_i32_14 = arith.constant 0 : i32
    %14 = arith.truncf %13 : vector<8x128xf32> to vector<8x128xbf16>
    %cst_15 = arith.constant dense<0.000000e+00> : vector<8x128xf32>
    %15 = tpu.matmul %14, %12, %cst_15 {dimension_numbers = #tpu.dot_dimension_numbers<[1], [0], [0], [1], [0, 0, 1, 1], [], []>} : vector<8x128xbf16>, vector<128x128xbf16>, vector<8x128xf32> -> vector<8x128xf32>
    %16 = arith.index_cast %c0_i32_14 : i32 to index
    %c0_16 = arith.constant 0 : index
    %c0_17 = arith.constant 0 : index
    %17 = vector.load %arg7[%16, %c0_16, %c0_17] : memref<8x8x128xf32, #tpu.memory_space<vmem>>, vector<1x8x128xf32>
    %18 = vector.shape_cast %17 : vector<1x8x128xf32> to vector<8x128xf32>
    %19 = arith.addf %15, %18 : vector<8x128xf32>
    %20 = math.tanh %19 : vector<8x128xf32>
    %21 = arith.index_cast %c0_i32_14 : i32 to index
    %c0_18 = arith.constant 0 : index
    %c0_19 = arith.constant 0 : index
    %22 = vector.load %arg7[%21, %c0_18, %c0_19] : memref<8x8x128xf32, #tpu.memory_space<vmem>>, vector<1x8x128xf32>
    %23 = vector.shape_cast %22 : vector<1x8x128xf32> to vector<8x128xf32>
    %24 = vector.shape_cast %20 : vector<8x128xf32> to vector<1x8x128xf32>
    tpu.vector_store %arg7[%21, %c0_18, %c0_19], %24 {strides = array<i32>} : memref<8x8x128xf32, #tpu.memory_space<vmem>>, vector<1x8x128xf32>,
    %c1_i32 = arith.constant 1 : i32
    %25 = arith.truncf %20 : vector<8x128xf32> to vector<8x128xbf16>
    %cst_20 = arith.constant dense<0.000000e+00> : vector<8x128xf32>
    %26 = tpu.matmul %25, %12, %cst_20 {dimension_numbers = #tpu.dot_dimension_numbers<[1], [0], [0], [1], [0, 0, 1, 1], [], []>} : vector<8x128xbf16>, vector<128x128xbf16>, vector<8x128xf32> -> vector<8x128xf32>
    %27 = arith.index_cast %c1_i32 : i32 to index
    %c0_21 = arith.constant 0 : index
    %c0_22 = arith.constant 0 : index
    %28 = vector.load %arg7[%27, %c0_21, %c0_22] : memref<8x8x128xf32, #tpu.memory_space<vmem>>, vector<1x8x128xf32>
    %29 = vector.shape_cast %28 : vector<1x8x128xf32> to vector<8x128xf32>
    %30 = arith.addf %26, %29 : vector<8x128xf32>
    %31 = math.tanh %30 : vector<8x128xf32>
    %32 = arith.index_cast %c1_i32 : i32 to index
    %c0_23 = arith.constant 0 : index
    %c0_24 = arith.constant 0 : index
    %33 = vector.load %arg7[%32, %c0_23, %c0_24] : memref<8x8x128xf32, #tpu.memory_space<vmem>>, vector<1x8x128xf32>
    %34 = vector.shape_cast %33 : vector<1x8x128xf32> to vector<8x128xf32>
    %35 = vector.shape_cast %31 : vector<8x128xf32> to vector<1x8x128xf32>
    tpu.vector_store %arg7[%32, %c0_23, %c0_24], %35 {strides = array<i32>} : memref<8x8x128xf32, #tpu.memory_space<vmem>>, vector<1x8x128xf32>,
    %c2_i32 = arith.constant 2 : i32
    %36 = arith.truncf %31 : vector<8x128xf32> to vector<8x128xbf16>
    %cst_25 = arith.constant dense<0.000000e+00> : vector<8x128xf32>
    %37 = tpu.matmul %36, %12, %cst_25 {dimension_numbers = #tpu.dot_dimension_numbers<[1], [0], [0], [1], [0, 0, 1, 1], [], []>} : vector<8x128xbf16>, vector<128x128xbf16>, vector<8x128xf32> -> vector<8x128xf32>
    %38 = arith.index_cast %c2_i32 : i32 to index
    %c0_26 = arith.constant 0 : index
    %c0_27 = arith.constant 0 : index
    %39 = vector.load %arg7[%38, %c0_26, %c0_27] : memref<8x8x128xf32, #tpu.memory_space<vmem>>, vector<1x8x128xf32>
    %40 = vector.shape_cast %39 : vector<1x8x128xf32> to vector<8x128xf32>
    %41 = arith.addf %37, %40 : vector<8x128xf32>
    %42 = math.tanh %41 : vector<8x128xf32>
    %43 = arith.index_cast %c2_i32 : i32 to index
    %c0_28 = arith.constant 0 : index
    %c0_29 = arith.constant 0 : index
    %44 = vector.load %arg7[%43, %c0_28, %c0_29] : memref<8x8x128xf32, #tpu.memory_space<vmem>>, vector<1x8x128xf32>
    %45 = vector.shape_cast %44 : vector<1x8x128xf32> to vector<8x128xf32>
    %46 = vector.shape_cast %42 : vector<8x128xf32> to vector<1x8x128xf32>
    tpu.vector_store %arg7[%43, %c0_28, %c0_29], %46 {strides = array<i32>} : memref<8x8x128xf32, #tpu.memory_space<vmem>>, vector<1x8x128xf32>,
    %c3_i32 = arith.constant 3 : i32
    %47 = arith.truncf %42 : vector<8x128xf32> to vector<8x128xbf16>
    %cst_30 = arith.constant dense<0.000000e+00> : vector<8x128xf32>
    %48 = tpu.matmul %47, %12, %cst_30 {dimension_numbers = #tpu.dot_dimension_numbers<[1], [0], [0], [1], [0, 0, 1, 1], [], []>} : vector<8x128xbf16>, vector<128x128xbf16>, vector<8x128xf32> -> vector<8x128xf32>
    %49 = arith.index_cast %c3_i32 : i32 to index
    %c0_31 = arith.constant 0 : index
    %c0_32 = arith.constant 0 : index
    %50 = vector.load %arg7[%49, %c0_31, %c0_32] : memref<8x8x128xf32, #tpu.memory_space<vmem>>, vector<1x8x128xf32>
    %51 = vector.shape_cast %50 : vector<1x8x128xf32> to vector<8x128xf32>
    %52 = arith.addf %48, %51 : vector<8x128xf32>
    %53 = math.tanh %52 : vector<8x128xf32>
    %54 = arith.index_cast %c3_i32 : i32 to index
    %c0_33 = arith.constant 0 : index
    %c0_34 = arith.constant 0 : index
    %55 = vector.load %arg7[%54, %c0_33, %c0_34] : memref<8x8x128xf32, #tpu.memory_space<vmem>>, vector<1x8x128xf32>
    %56 = vector.shape_cast %55 : vector<1x8x128xf32> to vector<8x128xf32>
    %57 = vector.shape_cast %53 : vector<8x128xf32> to vector<1x8x128xf32>
    tpu.vector_store %arg7[%54, %c0_33, %c0_34], %57 {strides = array<i32>} : memref<8x8x128xf32, #tpu.memory_space<vmem>>, vector<1x8x128xf32>,
    %c4_i32 = arith.constant 4 : i32
    %58 = arith.truncf %53 : vector<8x128xf32> to vector<8x128xbf16>
    %cst_35 = arith.constant dense<0.000000e+00> : vector<8x128xf32>
    %59 = tpu.matmul %58, %12, %cst_35 {dimension_numbers = #tpu.dot_dimension_numbers<[1], [0], [0], [1], [0, 0, 1, 1], [], []>} : vector<8x128xbf16>, vector<128x128xbf16>, vector<8x128xf32> -> vector<8x128xf32>
    %60 = arith.index_cast %c4_i32 : i32 to index
    %c0_36 = arith.constant 0 : index
    %c0_37 = arith.constant 0 : index
    %61 = vector.load %arg7[%60, %c0_36, %c0_37] : memref<8x8x128xf32, #tpu.memory_space<vmem>>, vector<1x8x128xf32>
    %62 = vector.shape_cast %61 : vector<1x8x128xf32> to vector<8x128xf32>
    %63 = arith.addf %59, %62 : vector<8x128xf32>
    %64 = math.tanh %63 : vector<8x128xf32>
    %65 = arith.index_cast %c4_i32 : i32 to index
    %c0_38 = arith.constant 0 : index
    %c0_39 = arith.constant 0 : index
    %66 = vector.load %arg7[%65, %c0_38, %c0_39] : memref<8x8x128xf32, #tpu.memory_space<vmem>>, vector<1x8x128xf32>
    %67 = vector.shape_cast %66 : vector<1x8x128xf32> to vector<8x128xf32>
    %68 = vector.shape_cast %64 : vector<8x128xf32> to vector<1x8x128xf32>
    tpu.vector_store %arg7[%65, %c0_38, %c0_39], %68 {strides = array<i32>} : memref<8x8x128xf32, #tpu.memory_space<vmem>>, vector<1x8x128xf32>,
    %c5_i32 = arith.constant 5 : i32
    %69 = arith.truncf %64 : vector<8x128xf32> to vector<8x128xbf16>
    %cst_40 = arith.constant dense<0.000000e+00> : vector<8x128xf32>
    %70 = tpu.matmul %69, %12, %cst_40 {dimension_numbers = #tpu.dot_dimension_numbers<[1], [0], [0], [1], [0, 0, 1, 1], [], []>} : vector<8x128xbf16>, vector<128x128xbf16>, vector<8x128xf32> -> vector<8x128xf32>
    %71 = arith.index_cast %c5_i32 : i32 to index
    %c0_41 = arith.constant 0 : index
    %c0_42 = arith.constant 0 : index
    %72 = vector.load %arg7[%71, %c0_41, %c0_42] : memref<8x8x128xf32, #tpu.memory_space<vmem>>, vector<1x8x128xf32>
    %73 = vector.shape_cast %72 : vector<1x8x128xf32> to vector<8x128xf32>
    %74 = arith.addf %70, %73 : vector<8x128xf32>
    %75 = math.tanh %74 : vector<8x128xf32>
    %76 = arith.index_cast %c5_i32 : i32 to index
    %c0_43 = arith.constant 0 : index
    %c0_44 = arith.constant 0 : index
    %77 = vector.load %arg7[%76, %c0_43, %c0_44] : memref<8x8x128xf32, #tpu.memory_space<vmem>>, vector<1x8x128xf32>
    %78 = vector.shape_cast %77 : vector<1x8x128xf32> to vector<8x128xf32>
    %79 = vector.shape_cast %75 : vector<8x128xf32> to vector<1x8x128xf32>
    tpu.vector_store %arg7[%76, %c0_43, %c0_44], %79 {strides = array<i32>} : memref<8x8x128xf32, #tpu.memory_space<vmem>>, vector<1x8x128xf32>,
    %c6_i32 = arith.constant 6 : i32
    %80 = arith.truncf %75 : vector<8x128xf32> to vector<8x128xbf16>
    %cst_45 = arith.constant dense<0.000000e+00> : vector<8x128xf32>
    %81 = tpu.matmul %80, %12, %cst_45 {dimension_numbers = #tpu.dot_dimension_numbers<[1], [0], [0], [1], [0, 0, 1, 1], [], []>} : vector<8x128xbf16>, vector<128x128xbf16>, vector<8x128xf32> -> vector<8x128xf32>
    %82 = arith.index_cast %c6_i32 : i32 to index
    %c0_46 = arith.constant 0 : index
    %c0_47 = arith.constant 0 : index
    %83 = vector.load %arg7[%82, %c0_46, %c0_47] : memref<8x8x128xf32, #tpu.memory_space<vmem>>, vector<1x8x128xf32>
    %84 = vector.shape_cast %83 : vector<1x8x128xf32> to vector<8x128xf32>
    %85 = arith.addf %81, %84 : vector<8x128xf32>
    %86 = math.tanh %85 : vector<8x128xf32>
    %87 = arith.index_cast %c6_i32 : i32 to index
    %c0_48 = arith.constant 0 : index
    %c0_49 = arith.constant 0 : index
    %88 = vector.load %arg7[%87, %c0_48, %c0_49] : memref<8x8x128xf32, #tpu.memory_space<vmem>>, vector<1x8x128xf32>
    %89 = vector.shape_cast %88 : vector<1x8x128xf32> to vector<8x128xf32>
    %90 = vector.shape_cast %86 : vector<8x128xf32> to vector<1x8x128xf32>
    tpu.vector_store %arg7[%87, %c0_48, %c0_49], %90 {strides = array<i32>} : memref<8x8x128xf32, #tpu.memory_space<vmem>>, vector<1x8x128xf32>,
    %c7_i32 = arith.constant 7 : i32
    %91 = arith.truncf %86 : vector<8x128xf32> to vector<8x128xbf16>
    %cst_50 = arith.constant dense<0.000000e+00> : vector<8x128xf32>
    %92 = tpu.matmul %91, %12, %cst_50 {dimension_numbers = #tpu.dot_dimension_numbers<[1], [0], [0], [1], [0, 0, 1, 1], [], []>} : vector<8x128xbf16>, vector<128x128xbf16>, vector<8x128xf32> -> vector<8x128xf32>
    %93 = arith.index_cast %c7_i32 : i32 to index
    %c0_51 = arith.constant 0 : index
    %c0_52 = arith.constant 0 : index
    %94 = vector.load %arg7[%93, %c0_51, %c0_52] : memref<8x8x128xf32, #tpu.memory_space<vmem>>, vector<1x8x128xf32>
    %95 = vector.shape_cast %94 : vector<1x8x128xf32> to vector<8x128xf32>
    %96 = arith.addf %92, %95 : vector<8x128xf32>
    %97 = math.tanh %96 : vector<8x128xf32>
    %98 = arith.index_cast %c7_i32 : i32 to index
    %c0_53 = arith.constant 0 : index
    %c0_54 = arith.constant 0 : index
    %99 = vector.load %arg7[%98, %c0_53, %c0_54] : memref<8x8x128xf32, #tpu.memory_space<vmem>>, vector<1x8x128xf32>
    %100 = vector.shape_cast %99 : vector<1x8x128xf32> to vector<8x128xf32>
    %101 = vector.shape_cast %97 : vector<8x128xf32> to vector<1x8x128xf32>
    tpu.vector_store %arg7[%98, %c0_53, %c0_54], %101 {strides = array<i32>} : memref<8x8x128xf32, #tpu.memory_space<vmem>>, vector<1x8x128xf32>,
    %c8_i32 = arith.constant 8 : i32
    %c0_55 = arith.constant 0 : index
    %c0_56 = arith.constant 0 : index
    %102 = vector.load %arg8[%c0_55, %c0_56] : memref<8x128xf32, #tpu.memory_space<vmem>>, vector<8x128xf32>
    tpu.vector_store %arg8[%c0_55, %c0_56], %97 {strides = array<i32>} : memref<8x128xf32, #tpu.memory_space<vmem>>, vector<8x128xf32>,
    return
  }
  func.func @transform_0(%arg0: i32, %arg1: i32) -> (i32, i32) {
    %c0_i32 = arith.constant 0 : i32
    %c0_i32_0 = arith.constant 0 : i32
    return %arg0, %c0_i32 : i32, i32
  }
  func.func @transform_1(%arg0: i32, %arg1: i32) -> (i32, i32, i32) {
    %c0_i32 = arith.constant 0 : i32
    %c0_i32_0 = arith.constant 0 : i32
    return %arg1, %arg0, %c0_i32 : i32, i32, i32
  }
  func.func @transform_2(%arg0: i32, %arg1: i32) -> (i32, i32) {
    %c0_i32 = arith.constant 0 : i32
    %c0_i32_0 = arith.constant 0 : i32
    %c0_i32_1 = arith.constant 0 : i32
    return %c0_i32, %c0_i32_0 : i32, i32
  }
  func.func @transform_3(%arg0: i32, %arg1: i32) -> (i32, i32) {
    %c0_i32 = arith.constant 0 : i32
    %c0_i32_0 = arith.constant 0 : i32
    %c0_i32_1 = arith.constant 0 : i32
    return %c0_i32, %c0_i32_0 : i32, i32
  }
  func.func @transform_4(%arg0: i32, %arg1: i32) -> (i32, i32) {
    %c0_i32 = arith.constant 0 : i32
    %c0_i32_0 = arith.constant 0 : i32
    %c0_i32_1 = arith.constant 0 : i32
    return %c0_i32, %c0_i32_0 : i32, i32
  }
  func.func @transform_5(%arg0: i32, %arg1: i32) -> (i32, i32, i32) {
    %c1_i32 = arith.constant 1 : i32
    %0 = arith.addi %arg1, %c1_i32 : i32
    %c0_i32 = arith.constant 0 : i32
    %c0_i32_0 = arith.constant 0 : i32
    return %0, %arg0, %c0_i32 : i32, i32, i32
  }
}

</mosaic_0001>

<bundles_post_ra>
// kernel: tpu_custom_call.1
= control target key start
LH: loop header
LB: loop body
LE: loop exit
PB: predicated region body
PF: predicated region fallthrough
CT: control target
= control target key end

     0   :  { %10 = vsyncpa [#allocation4], 0  ;;  %s1463_s0 = inlined_call_operand.hbm [shape: f32[8,128], index: 0, kind: input, shape index: {}]   ;;  %s1464_s1 = inlined_call_operand.hbm [shape: bf16[8,8,128], index: 1, kind: input, shape index: {}]   ;;  %s1465_s2 = inlined_call_operand.hbm [shape: bf16[128,128], index: 2, kind: input, shape index: {}]   ;;  %s1466_s3 = inlined_call_operand.hbm [shape: bf16[128,128], index: 3, kind: input, shape index: {}]   ;;  %s1467_s4 = inlined_call_operand.vmem [shape: f32[1,128], index: 4, kind: input, shape index: {}]   ;;  %s1468_s5 = inlined_call_operand.hbm [shape: f32[16,8,128], index: 5, kind: output, shape index: {}]  }
   0x1   :  { %11 = vsyncpa [#allocation7], 0 }
   0x2   :  { %12 = vsyncpa [#allocation10], 0 }
   0x3   :  { %13 = vsyncpa [#allocation5], 0  ;;  %s1165_s18 = smov [#allocation6]   ;;  %s1044_s22 = scalar_lea.hbm %s1464_s1, 512 }
   0x4   :  { %s29_s19 = sshll.u32 %s1165_s18, 4  ;;  %p1045_p0 = scmp.ne.s32.totalorder %s1464_s1, %s1044_s22  ;;  %s30_s19 = int_to_ptr.vmem [resolvable:$true] %s29_s19 }
   0x5   :  { %p1048_p1 = scmp.lt.u32.totalorder %s1044_s22, %s1464_s1 }
   0x7   :  { %p1050_p2 = pnand %p1048_p1, %p1045_p0 }
   0x9   :  { %1053 = shalt.err (!%p1050_p2)
}
   0xa   :  { %s1054_s27 = scalar_lea.vmem %s30_s19, 512  ;;  %p1059_p4 = scmp.lt.s32.totalorder %s30_s19, %s30_s19 }
   0xb   :  { %p1055_p3 = scmp.ne.s32.totalorder %s30_s19, %s1054_s27  ;;  %p1060_p5 = scmp.lt.s32.totalorder %s1054_s27, %s1054_s27 }
   0xd   :  { %p1061_p6 = por %p1060_p5, %p1059_p4 }
   0xf   :  { %p1062_p7 = pnand %p1061_p6, %p1055_p3 }
  0x11   :  { %1065 = shalt.err (!%p1062_p7)
}
  0x12   :  { %s1166_s28 = smov 64   ;;  %s1167_s29 = smov 4  }
  0x13   :  { %35 = dma.hbm_to_vmem [thread:$0]  %s1464_s1, 512, %s30_s19, [#allocation7], %s1166_s28, %s1166_s28, %s1167_s29  }
  0x14   :  { %s1168_s7 = smov [#allocation3]   ;;  %s1169_s9 = smov [#allocation8]  }
  0x15   :  { %s20_s8 = sshll.u32 %s1168_s7, 4  ;;  %s41_s10 = sshll.u32 %s1169_s9, 4  ;;  %s21_s8 = int_to_ptr.vmem [resolvable:$true] %s20_s8  ;;  %s42_s10 = int_to_ptr.vmem [resolvable:$true] %s41_s10 }
  0x16   :  { %s1066_s13 = scalar_lea.hbm %s1463_s0, 128 }
  0x17   :  { %p1067_p8 = scmp.ne.s32.totalorder %s1463_s0, %s1066_s13  ;;  %p1070_p9 = scmp.lt.u32.totalorder %s1066_s13, %s1463_s0 }
  0x19   :  { %p1072_p10 = pnand %p1070_p9, %p1067_p8 }
  0x1b   :  { %1075 = shalt.err (!%p1072_p10)
}
  0x1c   :  { %s1076_s1 = scalar_lea.vmem %s21_s8, 128  ;;  %p1081_p12 = scmp.lt.s32.totalorder %s21_s8, %s21_s8 }
  0x1d   :  { %p1077_p11 = scmp.ne.s32.totalorder %s21_s8, %s1076_s1  ;;  %p1082_p13 = scmp.lt.s32.totalorder %s1076_s1, %s1076_s1 }
  0x1f   :  { %p1083_p0 = por %p1082_p13, %p1081_p12 }
  0x21   :  { %p1084_p1 = pnand %p1083_p0, %p1077_p11 }
  0x23   :  { %1087 = shalt.err (!%p1084_p1)
}
  0x24   :  { %23 = dma.hbm_to_vmem [thread:$0]  %s1463_s0, 128, %s21_s8, [#allocation4]  }
  0x25   :  { %s1088_s22 = scalar_lea.hbm %s1465_s2, 1024 }
  0x26   :  { %p1089_p2 = scmp.ne.s32.totalorder %s1465_s2, %s1088_s22  ;;  %p1092_p3 = scmp.lt.u32.totalorder %s1088_s22, %s1465_s2 }
  0x28   :  { %p1094_p4 = pnand %p1092_p3, %p1089_p2 }
  0x2a   :  { %1097 = shalt.err (!%p1094_p4)
}
  0x2b   :  { %s1098_s27 = scalar_lea.vmem %s42_s10, 1024  ;;  %p1103_p6 = scmp.lt.s32.totalorder %s42_s10, %s42_s10 }
  0x2c   :  { %p1099_p5 = scmp.ne.s32.totalorder %s42_s10, %s1098_s27  ;;  %p1104_p7 = scmp.lt.s32.totalorder %s1098_s27, %s1098_s27 }
  0x2e   :  { %p1105_p8 = por %p1104_p7, %p1103_p6 }
  0x30   :  { %p1106_p9 = pnand %p1105_p8, %p1099_p5 }
  0x32   :  { %1109 = shalt.err (!%p1106_p9)
}
  0x33   :  { %47 = dma.hbm_to_vmem [thread:$0]  %s1465_s2, 1024, %s42_s10, [#allocation7], %s1166_s28, %s1166_s28, %s1167_s29  }
  0x34   :  { %s1170_s6 = smov [#allocation9]   ;;  %s1110_s11 = scalar_lea.hbm %s1466_s3, 1024 }
  0x35   :  { %s53_s7 = sshll.u32 %s1170_s6, 4  ;;  %p1111_p10 = scmp.ne.s32.totalorder %s1466_s3, %s1110_s11  ;;  %s54_s7 = int_to_ptr.vmem [resolvable:$true] %s53_s7 }
  0x36   :  { %p1114_p11 = scmp.lt.u32.totalorder %s1110_s11, %s1466_s3 }
  0x38   :  { %p1116_p12 = pnand %p1114_p11, %p1111_p10 }
  0x3a   :  { %1119 = shalt.err (!%p1116_p12)
}
  0x3b   :  { %s1120_s16 = scalar_lea.vmem %s54_s7, 1024  ;;  %p1125_p0 = scmp.lt.s32.totalorder %s54_s7, %s54_s7 }
  0x3c   :  { %p1121_p13 = scmp.ne.s32.totalorder %s54_s7, %s1120_s16  ;;  %p1126_p1 = scmp.lt.s32.totalorder %s1120_s16, %s1120_s16 }
  0x3e   :  { %p1127_p2 = por %p1126_p1, %p1125_p0 }
  0x40   :  { %p1128_p3 = pnand %p1127_p2, %p1121_p13 }
  0x42   :  { %1131 = shalt.err (!%p1128_p3)
}
  0x43   :  { %59 = dma.hbm_to_vmem [thread:$0]  %s1466_s3, 1024, %s54_s7, [#allocation10], %s1166_s28, %s1166_s28, %s1167_s29  }
  0x44   :  { %1157 = dma.done.wait [#allocation4], 128  }
  0x45   :  { %1158 = vsyncadd [#allocation4], 4294967168 }
  0x46   :  { %1159 = dma.done.wait [#allocation7], 1536  }
  0x47   :  { %1160 = vsyncadd [#allocation7], 4294965760 }
  0x48   :  { %1161 = dma.done.wait [#allocation10], 1024  }
  0x49   :  { %1162 = vsyncadd [#allocation10], 4294966272  ;;  %v1171_v0 = vmov 0.0   ;;  %vm1172_vm0 = vmmov 0   ;;  %v1008_v1 = vld [vmem:[#allocation8] sm:$0xff]   ;;  %v1009_v2 = vld [vmem:[#allocation8 + $0x8] sm:$0xff]  }
  0x4a   :  { %837 = vmatprep.subr.bf16.mxu1 %v1171_v0  ;;  %853 = vmatprep.mubr.msk.bf16.mxu1 %vm1172_vm0, %v1171_v0  ;;  %v1266_v3 = vld [vmem:[#allocation9] sm:$0xff]   ;;  %v1010_v4 = vld [vmem:[#allocation8 + $0x10] sm:$0xff]   ;;  %v1269_v5 = vld [vmem:[#allocation9 + $0x8] sm:$0xff]   ;;  %s707_s18 = scalar_lea.hbm %s1468_s5, 1024 }
  0x4b   :  { %813 = vmatprep.subr.bf16.mxu0 %v1008_v1  ;;  %838 = vmatpush3.bf16.msra.mxu1 %v1266_v3  ;;  %v1012_v6 = vld [vmem:[#allocation8 + $0x18] sm:$0xff]   ;;  %v1273_v7 = vld [vmem:[#allocation9 + $0x10] sm:$0xff]   ;;  %v1014_v8 = vld [vmem:[#allocation8 + $0x20] sm:$0xff]  }
  0x4c   :  { %814 = vmatpush3.bf16.msra.mxu0 %v1008_v1  ;;  %839 = vmatprep.subr.bf16.mxu1 %v1171_v0  ;;  %v1277_v9 = vld [vmem:[#allocation9 + $0x18] sm:$0xff]   ;;  %v1022_v10 = vld [vmem:[#allocation6] sm:$0xff]   ;;  %v1016_v11 = vld [vmem:[#allocation8 + $0x28] sm:$0xff]  }
  0x4d   :  { %815 = vmatprep.subr.bf16.mxu0 %v1009_v2  ;;  %829 = vmatprep.mubr.bf16.mxu0 %v1022_v10  ;;  %v1281_v12 = vld [vmem:[#allocation9 + $0x20] sm:$0xff]   ;;  %v1018_v13 = vld [vmem:[#allocation8 + $0x30] sm:$0xff]   ;;  %v1285_v14 = vld [vmem:[#allocation9 + $0x28] sm:$0xff]  }
  0x4e   :  { %v1020_v15 = vld [vmem:[#allocation8 + $0x38] sm:$0xff]   ;;  %v1289_v16 = vld [vmem:[#allocation9 + $0x30] sm:$0xff]   ;;  %v1023_v19 = vld [vmem:[#allocation6 + $0x8] sm:$0xff]  }
  0x4f   :  { %840 = vmatpush3.bf16.msra.mxu1 %v1269_v5  ;;  %v1293_v17 = vld [vmem:[#allocation9 + $0x38] sm:$0xff]   ;;  %v1026_v21 = vld [vmem:[#allocation6 + $0x10] sm:$0xff]  }
  0x50   :  { %816 = vmatpush3.bf16.msra.mxu0 %v1009_v2  ;;  %841 = vmatprep.subr.bf16.mxu1 %v1171_v0  ;;  %v81_v18 = vld [vmem:[#allocation3] sm:$0xff] }
  0x51   :  { %817 = vmatprep.subr.bf16.mxu0 %v1010_v4  ;;  %v276_v20 = vpack.c.bf16 %v81_v18, %v81_v18  ;;  %v1027_v22 = vld [vmem:[#allocation6 + $0x18] sm:$0xff]  }
  0x52   :  { %v1338_v23 = vld [vmem:[%s1467_s4] ss:$0 sm:$0xff]  ;;  %s1173_s4 = smov [#allocation11]  }
  0x53   :  { %842 = vmatpush3.bf16.msra.mxu1 %v1273_v7  ;;  %s693_s29 = sshll.u32 %s1173_s4, 4  ;;  %s694_s29 = int_to_ptr.vmem [resolvable:$true] %s693_s29 }
  0x54   :  { %818 = vmatpush3.bf16.msra.mxu0 %v1010_v4  ;;  %843 = vmatprep.subr.bf16.mxu1 %v1171_v0  ;;  %s1132_s19 = scalar_lea.vmem %s694_s29, 1024  ;;  %p1137_p5 = scmp.lt.s32.totalorder %s694_s29, %s694_s29 }
  0x55   :  { %819 = vmatprep.subr.bf16.mxu0 %v1012_v6  ;;  %p1133_p4 = scmp.ne.s32.totalorder %s694_s29, %s1132_s19  ;;  %p1138_p6 = scmp.lt.s32.totalorder %s1132_s19, %s1132_s19 }
  0x57   :  { %844 = vmatpush3.bf16.msra.mxu1 %v1277_v9  ;;  %p1139_p7 = por %p1138_p6, %p1137_p5 }
  0x58   :  { %820 = vmatpush3.bf16.msra.mxu0 %v1012_v6  ;;  %845 = vmatprep.subr.bf16.mxu1 %v1171_v0 }
  0x59   :  { %821 = vmatprep.subr.bf16.mxu0 %v1014_v8  ;;  %p1140_p8 = pnand %p1139_p7, %p1133_p4 }
  0x5b   :  { %846 = vmatpush3.bf16.msra.mxu1 %v1281_v12 }
  0x5c   :  { %822 = vmatpush3.bf16.msra.mxu0 %v1014_v8  ;;  %847 = vmatprep.subr.bf16.mxu1 %v1171_v0 }
  0x5d   :  { %823 = vmatprep.subr.bf16.mxu0 %v1016_v11 }
  0x5f   :  { %848 = vmatpush3.bf16.msra.mxu1 %v1285_v14 }
  0x60   :  { %824 = vmatpush3.bf16.msra.mxu0 %v1016_v11  ;;  %849 = vmatprep.subr.bf16.mxu1 %v1171_v0 }
  0x61   :  { %825 = vmatprep.subr.bf16.mxu0 %v1018_v13 }
  0x63   :  { %850 = vmatpush3.bf16.msra.mxu1 %v1289_v16 }
  0x64   :  { %826 = vmatpush3.bf16.msra.mxu0 %v1018_v13  ;;  %851 = vmatprep.subr.bf16.mxu1 %v1171_v0 }
  0x65   :  { %827 = vmatprep.subr.bf16.mxu0 %v1020_v15 }
  0x67   :  { %852 = vmatpush3.bf16.msra.mxu1 %v1293_v17 }
  0x68   :  { %828 = vmatpush3.bf16.msra.mxu0 %v1020_v15  ;;  %877 = vmatprep.subr.bf16.mxu1 %v1171_v0 }
  0x69   :  { %857 = vmatprep.subr.bf16.mxu0 %v1171_v0 }
  0x6a   :  { %854 = vmatmul.mubr.bf16.vlgmr.msra.gmra.mrb[0].mxu1 %v276_v20 }
  0x6b   :  { %830 = vmatmul.mubr.bf16.vlgmr.msra.gmra.mrb[0].mxu0 %v1023_v19  ;;  %878 = vmatpush3.bf16.msra.mxu1 %v1266_v3 }
  0x6c   :  { %858 = vmatpush3.bf16.msra.mxu0 %v1266_v3  ;;  %893 = vmatprep.mubr.msk.bf16.mxu1 %vm1172_vm0, %v1171_v0 }
  0x6d   :  { %859 = vmatprep.subr.bf16.mxu0 %v1171_v0  ;;  %879 = vmatprep.subr.bf16.mxu1 %v1171_v0 }
  0x6e   :  { %833 = vmatprep.mubr.bf16.mxu0 %v1026_v21 }
  0x6f   :  { %880 = vmatpush3.bf16.msra.mxu1 %v1269_v5 }
  0x70   :  { %860 = vmatpush3.bf16.msra.mxu0 %v1269_v5  ;;  %881 = vmatprep.subr.bf16.mxu1 %v1171_v0 }
  0x71   :  { %861 = vmatprep.subr.bf16.mxu0 %v1171_v0 }
  0x73   :  { %882 = vmatpush3.bf16.msra.mxu1 %v1273_v7  ;;  %834 = vmatmul.mubr.bf16.gmra.mrb[4].mxu0 %v1027_v22 }
  0x74   :  { %862 = vmatpush3.bf16.msra.mxu0 %v1273_v7  ;;  %883 = vmatprep.subr.bf16.mxu1 %v1171_v0 }
  0x75   :  { %863 = vmatprep.subr.bf16.mxu0 %v1171_v0  ;;  %873 = vmatprep.mubr.msk.bf16.mxu0 %vm1172_vm0, %v1171_v0 }
  0x77   :  { %884 = vmatpush3.bf16.msra.mxu1 %v1277_v9 }
  0x78   :  { %864 = vmatpush3.bf16.msra.mxu0 %v1277_v9  ;;  %885 = vmatprep.subr.bf16.mxu1 %v1171_v0 }
  0x79   :  { %865 = vmatprep.subr.bf16.mxu0 %v1171_v0 }
  0x7b   :  { %886 = vmatpush3.bf16.msra.mxu1 %v1281_v12 }
  0x7c   :  { %866 = vmatpush3.bf16.msra.mxu0 %v1281_v12  ;;  %887 = vmatprep.subr.bf16.mxu1 %v1171_v0 }
  0x7d   :  { %867 = vmatprep.subr.bf16.mxu0 %v1171_v0 }
  0x7f   :  { %888 = vmatpush3.bf16.msra.mxu1 %v1285_v14 }
  0x80   :  { %868 = vmatpush3.bf16.msra.mxu0 %v1285_v14  ;;  %889 = vmatprep.subr.bf16.mxu1 %v1171_v0 }
  0x81   :  { %869 = vmatprep.subr.bf16.mxu0 %v1171_v0 }
  0x83   :  { %890 = vmatpush3.bf16.msra.mxu1 %v1289_v16 }
  0x84   :  { %870 = vmatpush3.bf16.msra.mxu0 %v1289_v16  ;;  %891 = vmatprep.subr.bf16.mxu1 %v1171_v0 }
  0x85   :  { %871 = vmatprep.subr.bf16.mxu0 %v1171_v0 }
  0x87   :  { %892 = vmatpush3.bf16.msra.mxu1 %v1293_v17 }
  0x88   :  { %872 = vmatpush3.bf16.msra.mxu0 %v1293_v17  ;;  %917 = vmatprep.subr.bf16.mxu1 %v1171_v0 }
  0x89   :  { %897 = vmatprep.subr.bf16.mxu0 %v1171_v0 }
 0x13d   :  { %v360_v28 = vpop.f32.mrb[0].mxu1 }
 0x13e   :  { %v1340_v24 = vpop.f32.mrb[0].mxu0  ;;  %v855_v30 = vpop.f32.mrb[1].mxu1 }
 0x13f   :  { %v220_v25 = vpop.f32.mrb[1].mxu0  ;;  %v363_v32 = vpop.f32.mrb[2].mxu1  ;;  %v229_v48 = vadd.f32 %v1340_v24, %v1338_v23 }
 0x140   :  { %v221_v26 = vadd.f32 %v1338_v23, %v220_v25  ;;  %v1343_v27 = vpop.f32.mrb[2].mxu0  ;;  %v856_v33 = vpop.f32.mrb[3].mxu1 }
 0x141   :  { %v223_v29 = vpop.f32.mrb[3].mxu0  ;;  %v232_v56 = vadd.f32 %v1343_v27, %v1338_v23 }
 0x142   :  { %v361_v31 = vadd.f32 %v360_v28, %v221_v26  ;;  %v224_v40 = vadd.f32 %v1338_v23, %v223_v29 }
 0x144   :  { %1028 = vtanh.f32 %v361_v31 }
 0x146   :  { %v1363_v36 = vpop.f32.mrb[4].mxu0 }
 0x147   :  { %v1365_v37 = vpop.f32.mrb[5].mxu0 }
 0x148   :  { %v1367_v38 = vpop.f32.mrb[6].mxu0  ;;  %v237_v1 = vadd.f32 %v1338_v23, %v1365_v37 }
 0x149   :  { %v1369_v39 = vpop.f32.mrb[7].mxu0  ;;  %v248_v25 = vadd.f32 %v1367_v38, %v1338_v23 }
 0x14e   :  { %v1029_v34 = vpop.eup %1028 }
 0x14f   :  { %367 = vst [vmem:[#allocation11] sm:$0xff] %v1029_v34  ;;  %v368_v35 = vpack.c.bf16 %v1029_v34, %v1029_v34 }
 0x151   :  { %874 = vmatmul.mubr.bf16.vlgmr.msra.gmra.mrb[8].mxu0 %v368_v35 }
 0x152   :  { %898 = vmatpush3.bf16.msra.mxu0 %v1266_v3  ;;  %913 = vmatprep.mubr.msk.bf16.mxu0 %vm1172_vm0, %v1171_v0 }
 0x153   :  { %899 = vmatprep.subr.bf16.mxu0 %v1171_v0 }
 0x156   :  { %900 = vmatpush3.bf16.msra.mxu0 %v1269_v5 }
 0x157   :  { %901 = vmatprep.subr.bf16.mxu0 %v1171_v0 }
 0x15a   :  { %902 = vmatpush3.bf16.msra.mxu0 %v1273_v7 }
 0x15b   :  { %903 = vmatprep.subr.bf16.mxu0 %v1171_v0 }
 0x15e   :  { %904 = vmatpush3.bf16.msra.mxu0 %v1277_v9 }
 0x15f   :  { %905 = vmatprep.subr.bf16.mxu0 %v1171_v0 }
 0x162   :  { %906 = vmatpush3.bf16.msra.mxu0 %v1281_v12 }
 0x163   :  { %907 = vmatprep.subr.bf16.mxu0 %v1171_v0 }
 0x166   :  { %908 = vmatpush3.bf16.msra.mxu0 %v1285_v14 }
 0x167   :  { %909 = vmatprep.subr.bf16.mxu0 %v1171_v0 }
 0x16a   :  { %910 = vmatpush3.bf16.msra.mxu0 %v1289_v16 }
 0x16b   :  { %911 = vmatprep.subr.bf16.mxu0 %v1171_v0 }
 0x16e   :  { %912 = vmatpush3.bf16.msra.mxu0 %v1293_v17 }
 0x16f   :  { %937 = vmatprep.subr.bf16.mxu0 %v1171_v0 }
 0x224   :  { %v405_v41 = vpop.f32.mrb[8].mxu0 }
 0x225   :  { %v406_v42 = vadd.f32 %v405_v41, %v224_v40  ;;  %v875_v43 = vpop.f32.mrb[9].mxu0 }
 0x226   :  { %v408_v44 = vpop.f32.mrb[10].mxu0 }
 0x227   :  { %1030 = vtanh.f32 %v406_v42  ;;  %v876_v45 = vpop.f32.mrb[11].mxu0 }
 0x231   :  { %v1031_v46 = vpop.eup %1030 }
 0x232   :  { %412 = vst [vmem:[#allocation11 + $0x8] sm:$0xff] %v1031_v46  ;;  %v413_v47 = vpack.c.bf16 %v1031_v46, %v1031_v46 }
 0x234   :  { %894 = vmatmul.mubr.bf16.vlgmr.msra.gmra.mrb[4].mxu1 %v413_v47 }
 0x235   :  { %918 = vmatpush3.bf16.msra.mxu1 %v1266_v3  ;;  %933 = vmatprep.mubr.msk.bf16.mxu1 %vm1172_vm0, %v1171_v0 }
 0x236   :  { %919 = vmatprep.subr.bf16.mxu1 %v1171_v0 }
 0x239   :  { %920 = vmatpush3.bf16.msra.mxu1 %v1269_v5 }
 0x23a   :  { %921 = vmatprep.subr.bf16.mxu1 %v1171_v0 }
 0x23d   :  { %922 = vmatpush3.bf16.msra.mxu1 %v1273_v7 }
 0x23e   :  { %923 = vmatprep.subr.bf16.mxu1 %v1171_v0 }
 0x241   :  { %924 = vmatpush3.bf16.msra.mxu1 %v1277_v9 }
 0x242   :  { %925 = vmatprep.subr.bf16.mxu1 %v1171_v0 }
 0x245   :  { %926 = vmatpush3.bf16.msra.mxu1 %v1281_v12 }
 0x246   :  { %927 = vmatprep.subr.bf16.mxu1 %v1171_v0 }
 0x249   :  { %928 = vmatpush3.bf16.msra.mxu1 %v1285_v14 }
 0x24a   :  { %929 = vmatprep.subr.bf16.mxu1 %v1171_v0 }
 0x24d   :  { %930 = vmatpush3.bf16.msra.mxu1 %v1289_v16 }
 0x24e   :  { %931 = vmatprep.subr.bf16.mxu1 %v1171_v0 }
 0x251   :  { %932 = vmatpush3.bf16.msra.mxu1 %v1293_v17 }
 0x252   :  { %957 = vmatprep.subr.bf16.mxu1 %v1171_v0 }
 0x307   :  { %v450_v49 = vpop.f32.mrb[4].mxu1 }
 0x308   :  { %v451_v50 = vadd.f32 %v450_v49, %v229_v48  ;;  %v895_v51 = vpop.f32.mrb[5].mxu1 }
 0x309   :  { %v453_v52 = vpop.f32.mrb[6].mxu1 }
 0x30a   :  { %1032 = vtanh.f32 %v451_v50  ;;  %v896_v53 = vpop.f32.mrb[7].mxu1 }
 0x314   :  { %v1033_v54 = vpop.eup %1032 }
 0x315   :  { %457 = vst [vmem:[#allocation11 + $0x10] sm:$0xff] %v1033_v54  ;;  %v458_v55 = vpack.c.bf16 %v1033_v54, %v1033_v54 }
 0x317   :  { %914 = vmatmul.mubr.bf16.vlgmr.msra.gmra.mrb[12].mxu0 %v458_v55 }
 0x318   :  { %938 = vmatpush3.bf16.msra.mxu0 %v1266_v3  ;;  %953 = vmatprep.mubr.msk.bf16.mxu0 %vm1172_vm0, %v1171_v0 }
 0x319   :  { %939 = vmatprep.subr.bf16.mxu0 %v1171_v0 }
 0x31c   :  { %940 = vmatpush3.bf16.msra.mxu0 %v1269_v5 }
 0x31d   :  { %941 = vmatprep.subr.bf16.mxu0 %v1171_v0 }
 0x320   :  { %942 = vmatpush3.bf16.msra.mxu0 %v1273_v7 }
 0x321   :  { %943 = vmatprep.subr.bf16.mxu0 %v1171_v0 }
 0x324   :  { %944 = vmatpush3.bf16.msra.mxu0 %v1277_v9 }
 0x325   :  { %945 = vmatprep.subr.bf16.mxu0 %v1171_v0 }
 0x328   :  { %946 = vmatpush3.bf16.msra.mxu0 %v1281_v12 }
 0x329   :  { %947 = vmatprep.subr.bf16.mxu0 %v1171_v0 }
 0x32c   :  { %948 = vmatpush3.bf16.msra.mxu0 %v1285_v14 }
 0x32d   :  { %949 = vmatprep.subr.bf16.mxu0 %v1171_v0 }
 0x330   :  { %950 = vmatpush3.bf16.msra.mxu0 %v1289_v16 }
 0x331   :  { %951 = vmatprep.subr.bf16.mxu0 %v1171_v0 }
 0x334   :  { %952 = vmatpush3.bf16.msra.mxu0 %v1293_v17 }
 0x335   :  { %977 = vmatprep.subr.bf16.mxu0 %v1171_v0 }
 0x3ea   :  { %v495_v57 = vpop.f32.mrb[12].mxu0 }
 0x3eb   :  { %v496_v58 = vadd.f32 %v495_v57, %v232_v56  ;;  %v915_v59 = vpop.f32.mrb[13].mxu0 }
 0x3ec   :  { %v498_v60 = vpop.f32.mrb[14].mxu0 }
 0x3ed   :  { %1034 = vtanh.f32 %v496_v58  ;;  %v916_v61 = vpop.f32.mrb[15].mxu0 }
 0x3f7   :  { %v1035_v62 = vpop.eup %1034 }
 0x3f8   :  { %502 = vst [vmem:[#allocation11 + $0x18] sm:$0xff] %v1035_v62  ;;  %v503_v63 = vpack.c.bf16 %v1035_v62, %v1035_v62 }
 0x3fa   :  { %934 = vmatmul.mubr.bf16.vlgmr.msra.gmra.mrb[8].mxu1 %v503_v63 }
 0x3fb   :  { %958 = vmatpush3.bf16.msra.mxu1 %v1266_v3  ;;  %973 = vmatprep.mubr.msk.bf16.mxu1 %vm1172_vm0, %v1171_v0 }
 0x3fc   :  { %959 = vmatprep.subr.bf16.mxu1 %v1171_v0 }
 0x3ff   :  { %960 = vmatpush3.bf16.msra.mxu1 %v1269_v5 }
 0x400   :  { %961 = vmatprep.subr.bf16.mxu1 %v1171_v0 }
 0x403   :  { %962 = vmatpush3.bf16.msra.mxu1 %v1273_v7 }
 0x404   :  { %963 = vmatprep.subr.bf16.mxu1 %v1171_v0 }
 0x407   :  { %964 = vmatpush3.bf16.msra.mxu1 %v1277_v9 }
 0x408   :  { %965 = vmatprep.subr.bf16.mxu1 %v1171_v0 }
 0x40b   :  { %966 = vmatpush3.bf16.msra.mxu1 %v1281_v12 }
 0x40c   :  { %967 = vmatprep.subr.bf16.mxu1 %v1171_v0 }
 0x40f   :  { %968 = vmatpush3.bf16.msra.mxu1 %v1285_v14 }
 0x410   :  { %969 = vmatprep.subr.bf16.mxu1 %v1171_v0 }
 0x413   :  { %970 = vmatpush3.bf16.msra.mxu1 %v1289_v16 }
 0x414   :  { %971 = vmatprep.subr.bf16.mxu1 %v1171_v0 }
 0x417   :  { %972 = vmatpush3.bf16.msra.mxu1 %v1293_v17 }
 0x4cd   :  { %v540_v2 = vpop.f32.mrb[8].mxu1 }
 0x4ce   :  { %v541_v4 = vadd.f32 %v540_v2, %v237_v1  ;;  %v935_v6 = vpop.f32.mrb[9].mxu1 }
 0x4cf   :  { %v543_v8 = vpop.f32.mrb[10].mxu1 }
 0x4d0   :  { %1036 = vtanh.f32 %v541_v4  ;;  %v936_v10 = vpop.f32.mrb[11].mxu1 }
 0x4da   :  { %v1037_v11 = vpop.eup %1036 }
 0x4db   :  { %547 = vst [vmem:[#allocation11 + $0x20] sm:$0xff] %v1037_v11  ;;  %v548_v13 = vpack.c.bf16 %v1037_v11, %v1037_v11 }
 0x4dd   :  { %954 = vmatmul.mubr.bf16.vlgmr.msra.gmra.mrb[16].mxu0 %v548_v13 }
 0x4de   :  { %978 = vmatpush3.bf16.msra.mxu0 %v1266_v3  ;;  %993 = vmatprep.mubr.msk.bf16.mxu0 %vm1172_vm0, %v1171_v0  ;;  %v240_v3 = vadd.f32 %v1338_v23, %v1369_v39 }
 0x4df   :  { %979 = vmatprep.subr.bf16.mxu0 %v1171_v0 }
 0x4e2   :  { %980 = vmatpush3.bf16.msra.mxu0 %v1269_v5 }
 0x4e3   :  { %981 = vmatprep.subr.bf16.mxu0 %v1171_v0 }
 0x4e6   :  { %982 = vmatpush3.bf16.msra.mxu0 %v1273_v7 }
 0x4e7   :  { %983 = vmatprep.subr.bf16.mxu0 %v1171_v0 }
 0x4ea   :  { %984 = vmatpush3.bf16.msra.mxu0 %v1277_v9 }
 0x4eb   :  { %985 = vmatprep.subr.bf16.mxu0 %v1171_v0 }
 0x4ee   :  { %986 = vmatpush3.bf16.msra.mxu0 %v1281_v12 }
 0x4ef   :  { %987 = vmatprep.subr.bf16.mxu0 %v1171_v0 }
 0x4f2   :  { %988 = vmatpush3.bf16.msra.mxu0 %v1285_v14 }
 0x4f3   :  { %989 = vmatprep.subr.bf16.mxu0 %v1171_v0 }
 0x4f6   :  { %990 = vmatpush3.bf16.msra.mxu0 %v1289_v16  ;;  %v245_v16 = vadd.f32 %v1363_v36, %v1338_v23 }
 0x4f7   :  { %991 = vmatprep.subr.bf16.mxu0 %v1171_v0 }
 0x4fa   :  { %992 = vmatpush3.bf16.msra.mxu0 %v1293_v17 }
 0x5b0   :  { %v585_v5 = vpop.f32.mrb[16].mxu0 }
 0x5b1   :  { %v586_v7 = vadd.f32 %v585_v5, %v240_v3  ;;  %v955_v9 = vpop.f32.mrb[17].mxu0 }
 0x5b2   :  { %v588_v15 = vpop.f32.mrb[18].mxu0 }
 0x5b3   :  { %1038 = vtanh.f32 %v586_v7  ;;  %v956_v12 = vpop.f32.mrb[19].mxu0 }
 0x5bd   :  { %v1039_v18 = vpop.eup %1038 }
 0x5be   :  { %592 = vst [vmem:[#allocation11 + $0x28] sm:$0xff] %v1039_v18  ;;  %v593_v14 = vpack.c.bf16 %v1039_v18, %v1039_v18 }
 0x5c0   :  { %974 = vmatmul.mubr.bf16.vlgmr.msra.gmra.mrb[12].mxu1 %v593_v14 }
 0x693   :  { %v630_v19 = vpop.f32.mrb[12].mxu1 }
 0x694   :  { %v631_v0 = vadd.f32 %v630_v19, %v245_v16  ;;  %v975_v20 = vpop.f32.mrb[13].mxu1 }
 0x695   :  { %v633_v17 = vpop.f32.mrb[14].mxu1 }
 0x696   :  { %1040 = vtanh.f32 %v631_v0  ;;  %v976_v21 = vpop.f32.mrb[15].mxu1 }
 0x6a0   :  { %v1041_v22 = vpop.eup %1040 }
 0x6a1   :  { %637 = vst [vmem:[#allocation11 + $0x30] sm:$0xff] %v1041_v22  ;;  %v638_v24 = vpack.c.bf16 %v1041_v22, %v1041_v22 }
 0x6a3   :  { %994 = vmatmul.mubr.bf16.vlgmr.msra.gmra.mrb[20].mxu0 %v638_v24 }
 0x776   :  { %v675_v26 = vpop.f32.mrb[20].mxu0 }
 0x777   :  { %v676_v27 = vadd.f32 %v675_v26, %v248_v25  ;;  %v995_v28 = vpop.f32.mrb[21].mxu0 }
 0x778   :  { %v678_v29 = vpop.f32.mrb[22].mxu0 }
 0x779   :  { %1042 = vtanh.f32 %v676_v27  ;;  %v996_v30 = vpop.f32.mrb[23].mxu0 }
 0x783   :  { %v1043_v31 = vpop.eup %1042 }
 0x784   :  { %682 = vst [vmem:[#allocation11 + $0x38] sm:$0xff] %v1043_v31 }
 0x785   :  { %1143 = shalt.err (!%p1140_p8)
}
 0x786   :  { %s1156_s22 = scalar_lea.hbm %s1468_s5, 2048  ;;  %p1147_p10 = scmp.lt.u32.totalorder %s707_s18, %s1468_s5 }
 0x787   :  { %p1145_p9 = scmp.ne.s32.totalorder %s707_s18, %s1156_s22  ;;  %p1148_p11 = scmp.lt.u32.totalorder %s1156_s22, %s1156_s22 }
 0x788   :  { %p1150_p13 = scmp.lt.u32.totalorder %s1156_s22, %s707_s18 }
 0x789   :  { %p1149_p12 = por %p1148_p11, %p1147_p10 }
 0x78b   :  { %p1151_p0 = por %p1150_p13, %p1149_p12 }
 0x78d   :  { %p1152_p1 = pnand %p1151_p0, %p1145_p9 }
 0x78f   :  { %1155 = shalt.err (!%p1152_p1)
}
 0x790   :  { %s1174_s25 = smov 128   ;;  %s1175_s26 = smov 8  }
 0x791   :  { %699 = dma.vmem_to_hbm [thread:$0]  %s694_s29, 1024, %s707_s18, [#allocation5], %s1174_s25, %s1174_s25, %s1175_s26  }
 0x792   :  { %1163 = dma.done.wait [#allocation5], 1024  }
 0x793   :  { %1164 = vsyncadd [#allocation5], 4294966272 }
 0x794   :  { %703 = vsyncpa [#allocation4], 1 }
 0x795   :  { %704 = vsyncpa [#allocation7], 1 }
 0x796   :  { %705 = vsyncpa [#allocation10], 1 }
 0x797   :  { %706 = vsyncpa [#allocation5], 1 }

// kernel: tpu_custom_call.1
= control target key start
LH: loop header
LB: loop body
LE: loop exit
PB: predicated region body
PF: predicated region fallthrough
CT: control target
= control target key end

     0   :  { %10 = vsyncpa [#allocation4], 0  ;;  %s1463_s0 = inlined_call_operand.hbm [shape: f32[8,128], index: 0, kind: input, shape index: {}]   ;;  %s1464_s1 = inlined_call_operand.hbm [shape: bf16[8,8,128], index: 1, kind: input, shape index: {}]   ;;  %s1465_s2 = inlined_call_operand.hbm [shape: bf16[128,128], index: 2, kind: input, shape index: {}]   ;;  %s1466_s3 = inlined_call_operand.hbm [shape: bf16[128,128], index: 3, kind: input, shape index: {}]   ;;  %s1467_s4 = inlined_call_operand.vmem [shape: f32[1,128], index: 4, kind: input, shape index: {}]   ;;  %s1468_s5 = inlined_call_operand.hbm [shape: f32[16,8,128], index: 5, kind: output, shape index: {}]  }
   0x1   :  { %11 = vsyncpa [#allocation7], 0 }
   0x2   :  { %12 = vsyncpa [#allocation10], 0 }
   0x3   :  { %13 = vsyncpa [#allocation5], 0  ;;  %s1165_s18 = smov [#allocation6]   ;;  %s1044_s22 = scalar_lea.hbm %s1464_s1, 512 }
   0x4   :  { %s29_s19 = sshll.u32 %s1165_s18, 4  ;;  %p1045_p0 = scmp.ne.s32.totalorder %s1464_s1, %s1044_s22  ;;  %s30_s19 = int_to_ptr.vmem [resolvable:$true] %s29_s19 }
   0x5   :  { %p1048_p1 = scmp.lt.u32.totalorder %s1044_s22, %s1464_s1 }
   0x7   :  { %p1050_p2 = pnand %p1048_p1, %p1045_p0 }
   0x9   :  { %1053 = shalt.err (!%p1050_p2)
}
   0xa   :  { %s1054_s27 = scalar_lea.vmem %s30_s19, 512  ;;  %p1059_p4 = scmp.lt.s32.totalorder %s30_s19, %s30_s19 }
   0xb   :  { %p1055_p3 = scmp.ne.s32.totalorder %s30_s19, %s1054_s27  ;;  %p1060_p5 = scmp.lt.s32.totalorder %s1054_s27, %s1054_s27 }
   0xd   :  { %p1061_p6 = por %p1060_p5, %p1059_p4 }
   0xf   :  { %p1062_p7 = pnand %p1061_p6, %p1055_p3 }
  0x11   :  { %1065 = shalt.err (!%p1062_p7)
}
  0x12   :  { %s1166_s28 = smov 64   ;;  %s1167_s29 = smov 4  }
  0x13   :  { %35 = dma.hbm_to_vmem [thread:$0]  %s1464_s1, 512, %s30_s19, [#allocation7], %s1166_s28, %s1166_s28, %s1167_s29  }
  0x14   :  { %s1168_s7 = smov [#allocation3]   ;;  %s1169_s9 = smov [#allocation8]  }
  0x15   :  { %s20_s8 = sshll.u32 %s1168_s7, 4  ;;  %s41_s10 = sshll.u32 %s1169_s9, 4  ;;  %s21_s8 = int_to_ptr.vmem [resolvable:$true] %s20_s8  ;;  %s42_s10 = int_to_ptr.vmem [resolvable:$true] %s41_s10 }
  0x16   :  { %s1066_s13 = scalar_lea.hbm %s1463_s0, 128 }
  0x17   :  { %p1067_p8 = scmp.ne.s32.totalorder %s1463_s0, %s1066_s13  ;;  %p1070_p9 = scmp.lt.u32.totalorder %s1066_s13, %s1463_s0 }
  0x19   :  { %p1072_p10 = pnand %p1070_p9, %p1067_p8 }
  0x1b   :  { %1075 = shalt.err (!%p1072_p10)
}
  0x1c   :  { %s1076_s1 = scalar_lea.vmem %s21_s8, 128  ;;  %p1081_p12 = scmp.lt.s32.totalorder %s21_s8, %s21_s8 }
  0x1d   :  { %p1077_p11 = scmp.ne.s32.totalorder %s21_s8, %s1076_s1  ;;  %p1082_p13 = scmp.lt.s32.totalorder %s1076_s1, %s1076_s1 }
  0x1f   :  { %p1083_p0 = por %p1082_p13, %p1081_p12 }
  0x21   :  { %p1084_p1 = pnand %p1083_p0, %p1077_p11 }
  0x23   :  { %1087 = shalt.err (!%p1084_p1)
}
  0x24   :  { %23 = dma.hbm_to_vmem [thread:$0]  %s1463_s0, 128, %s21_s8, [#allocation4]  }
  0x25   :  { %s1088_s22 = scalar_lea.hbm %s1465_s2, 1024 }
  0x26   :  { %p1089_p2 = scmp.ne.s32.totalorder %s1465_s2, %s1088_s22  ;;  %p1092_p3 = scmp.lt.u32.totalorder %s1088_s22, %s1465_s2 }
  0x28   :  { %p1094_p4 = pnand %p1092_p3, %p1089_p2 }
  0x2a   :  { %1097 = shalt.err (!%p1094_p4)
}
  0x2b   :  { %s1098_s27 = scalar_lea.vmem %s42_s10, 1024  ;;  %p1103_p6 = scmp.lt.s32.totalorder %s42_s10, %s42_s10 }
  0x2c   :  { %p1099_p5 = scmp.ne.s32.totalorder %s42_s10, %s1098_s27  ;;  %p1104_p7 = scmp.lt.s32.totalorder %s1098_s27, %s1098_s27 }
  0x2e   :  { %p1105_p8 = por %p1104_p7, %p1103_p6 }
  0x30   :  { %p1106_p9 = pnand %p1105_p8, %p1099_p5 }
  0x32   :  { %1109 = shalt.err (!%p1106_p9)
}
  0x33   :  { %47 = dma.hbm_to_vmem [thread:$0]  %s1465_s2, 1024, %s42_s10, [#allocation7], %s1166_s28, %s1166_s28, %s1167_s29  }
  0x34   :  { %s1170_s6 = smov [#allocation9]   ;;  %s1110_s11 = scalar_lea.hbm %s1466_s3, 1024 }
  0x35   :  { %s53_s7 = sshll.u32 %s1170_s6, 4  ;;  %p1111_p10 = scmp.ne.s32.totalorder %s1466_s3, %s1110_s11  ;;  %s54_s7 = int_to_ptr.vmem [resolvable:$true] %s53_s7 }
  0x36   :  { %p1114_p11 = scmp.lt.u32.totalorder %s1110_s11, %s1466_s3 }
  0x38   :  { %p1116_p12 = pnand %p1114_p11, %p1111_p10 }
  0x3a   :  { %1119 = shalt.err (!%p1116_p12)
}
  0x3b   :  { %s1120_s16 = scalar_lea.vmem %s54_s7, 1024  ;;  %p1125_p0 = scmp.lt.s32.totalorder %s54_s7, %s54_s7 }
  0x3c   :  { %p1121_p13 = scmp.ne.s32.totalorder %s54_s7, %s1120_s16  ;;  %p1126_p1 = scmp.lt.s32.totalorder %s1120_s16, %s1120_s16 }
  0x3e   :  { %p1127_p2 = por %p1126_p1, %p1125_p0 }
  0x40   :  { %p1128_p3 = pnand %p1127_p2, %p1121_p13 }
  0x42   :  { %1131 = shalt.err (!%p1128_p3)
}
  0x43   :  { %59 = dma.hbm_to_vmem [thread:$0]  %s1466_s3, 1024, %s54_s7, [#allocation10], %s1166_s28, %s1166_s28, %s1167_s29  }
  0x44   :  { %1157 = dma.done.wait [#allocation4], 128  }
  0x45   :  { %1158 = vsyncadd [#allocation4], 4294967168 }
  0x46   :  { %1159 = dma.done.wait [#allocation7], 1536  }
  0x47   :  { %1160 = vsyncadd [#allocation7], 4294965760 }
  0x48   :  { %1161 = dma.done.wait [#allocation10], 1024  }
  0x49   :  { %1162 = vsyncadd [#allocation10], 4294966272  ;;  %v1171_v0 = vmov 0.0   ;;  %vm1172_vm0 = vmmov 0   ;;  %v1008_v1 = vld [vmem:[#allocation8] sm:$0xff]   ;;  %v1009_v2 = vld [vmem:[#allocation8 + $0x8] sm:$0xff]  }
  0x4a   :  { %837 = vmatprep.subr.bf16.mxu1 %v1171_v0  ;;  %853 = vmatprep.mubr.msk.bf16.mxu1 %vm1172_vm0, %v1171_v0  ;;  %v1266_v3 = vld [vmem:[#allocation9] sm:$0xff]   ;;  %v1010_v4 = vld [vmem:[#allocation8 + $0x10] sm:$0xff]   ;;  %v1269_v5 = vld [vmem:[#allocation9 + $0x8] sm:$0xff]   ;;  %s707_s18 = scalar_lea.hbm %s1468_s5, 1024 }
  0x4b   :  { %813 = vmatprep.subr.bf16.mxu0 %v1008_v1  ;;  %838 = vmatpush3.bf16.msra.mxu1 %v1266_v3  ;;  %v1012_v6 = vld [vmem:[#allocation8 + $0x18] sm:$0xff]   ;;  %v1273_v7 = vld [vmem:[#allocation9 + $0x10] sm:$0xff]   ;;  %v1014_v8 = vld [vmem:[#allocation8 + $0x20] sm:$0xff]  }
  0x4c   :  { %814 = vmatpush3.bf16.msra.mxu0 %v1008_v1  ;;  %839 = vmatprep.subr.bf16.mxu1 %v1171_v0  ;;  %v1277_v9 = vld [vmem:[#allocation9 + $0x18] sm:$0xff]   ;;  %v1022_v10 = vld [vmem:[#allocation6] sm:$0xff]   ;;  %v1016_v11 = vld [vmem:[#allocation8 + $0x28] sm:$0xff]  }
  0x4d   :  { %815 = vmatprep.subr.bf16.mxu0 %v1009_v2  ;;  %829 = vmatprep.mubr.bf16.mxu0 %v1022_v10  ;;  %v1281_v12 = vld [vmem:[#allocation9 + $0x20] sm:$0xff]   ;;  %v1018_v13 = vld [vmem:[#allocation8 + $0x30] sm:$0xff]   ;;  %v1285_v14 = vld [vmem:[#allocation9 + $0x28] sm:$0xff]  }
  0x4e   :  { %v1020_v15 = vld [vmem:[#allocation8 + $0x38] sm:$0xff]   ;;  %v1289_v16 = vld [vmem:[#allocation9 + $0x30] sm:$0xff]   ;;  %v1023_v19 = vld [vmem:[#allocation6 + $0x8] sm:$0xff]  }
  0x4f   :  { %840 = vmatpush3.bf16.msra.mxu1 %v1269_v5  ;;  %v1293_v17 = vld [vmem:[#allocation9 + $0x38] sm:$0xff]   ;;  %v1026_v21 = vld [vmem:[#allocation6 + $0x10] sm:$0xff]  }
  0x50   :  { %816 = vmatpush3.bf16.msra.mxu0 %v1009_v2  ;;  %841 = vmatprep.subr.bf16.mxu1 %v1171_v0  ;;  %v81_v18 = vld [vmem:[#allocation3] sm:$0xff] }
  0x51   :  { %817 = vmatprep.subr.bf16.mxu0 %v1010_v4  ;;  %v276_v20 = vpack.c.bf16 %v81_v18, %v81_v18  ;;  %v1027_v22 = vld [vmem:[#allocation6 + $0x18] sm:$0xff]  }
  0x52   :  { %v1338_v23 = vld [vmem:[%s1467_s4] ss:$0 sm:$0xff]  ;;  %s1173_s4 = smov [#allocation11]  }
  0x53   :  { %842 = vmatpush3.bf16.msra.mxu1 %v1273_v7  ;;  %s693_s29 = sshll.u32 %s1173_s4, 4  ;;  %s694_s29 = int_to_ptr.vmem [resolvable:$true] %s693_s29 }
  0x54   :  { %818 = vmatpush3.bf16.msra.mxu0 %v1010_v4  ;;  %843 = vmatprep.subr.bf16.mxu1 %v1171_v0  ;;  %s1132_s19 = scalar_lea.vmem %s694_s29, 1024  ;;  %p1137_p5 = scmp.lt.s32.totalorder %s694_s29, %s694_s29 }
  0x55   :  { %819 = vmatprep.subr.bf16.mxu0 %v1012_v6  ;;  %p1133_p4 = scmp.ne.s32.totalorder %s694_s29, %s1132_s19  ;;  %p1138_p6 = scmp.lt.s32.totalorder %s1132_s19, %s1132_s19 }
  0x57   :  { %844 = vmatpush3.bf16.msra.mxu1 %v1277_v9  ;;  %p1139_p7 = por %p1138_p6, %p1137_p5 }
  0x58   :  { %820 = vmatpush3.bf16.msra.mxu0 %v1012_v6  ;;  %845 = vmatprep.subr.bf16.mxu1 %v1171_v0 }
  0x59   :  { %821 = vmatprep.subr.bf16.mxu0 %v1014_v8  ;;  %p1140_p8 = pnand %p1139_p7, %p1133_p4 }
  0x5b   :  { %846 = vmatpush3.bf16.msra.mxu1 %v1281_v12 }
  0x5c   :  { %822 = vmatpush3.bf16.msra.mxu0 %v1014_v8  ;;  %847 = vmatprep.subr.bf16.mxu1 %v1171_v0 }
  0x5d   :  { %823 = vmatprep.subr.bf16.mxu0 %v1016_v11 }
  0x5f   :  { %848 = vmatpush3.bf16.msra.mxu1 %v1285_v14 }
  0x60   :  { %824 = vmatpush3.bf16.msra.mxu0 %v1016_v11  ;;  %849 = vmatprep.subr.bf16.mxu1 %v1171_v0 }
  0x61   :  { %825 = vmatprep.subr.bf16.mxu0 %v1018_v13 }
  0x63   :  { %850 = vmatpush3.bf16.msra.mxu1 %v1289_v16 }
  0x64   :  { %826 = vmatpush3.bf16.msra.mxu0 %v1018_v13  ;;  %851 = vmatprep.subr.bf16.mxu1 %v1171_v0 }
  0x65   :  { %827 = vmatprep.subr.bf16.mxu0 %v1020_v15 }
  0x67   :  { %852 = vmatpush3.bf16.msra.mxu1 %v1293_v17 }
  0x68   :  { %828 = vmatpush3.bf16.msra.mxu0 %v1020_v15  ;;  %877 = vmatprep.subr.bf16.mxu1 %v1171_v0 }
  0x69   :  { %857 = vmatprep.subr.bf16.mxu0 %v1171_v0 }
  0x6a   :  { %854 = vmatmul.mubr.bf16.vlgmr.msra.gmra.mrb[0].mxu1 %v276_v20 }
  0x6b   :  { %830 = vmatmul.mubr.bf16.vlgmr.msra.gmra.mrb[0].mxu0 %v1023_v19  ;;  %878 = vmatpush3.bf16.msra.mxu1 %v1266_v3 }
  0x6c   :  { %858 = vmatpush3.bf16.msra.mxu0 %v1266_v3  ;;  %893 = vmatprep.mubr.msk.bf16.mxu1 %vm1172_vm0, %v1171_v0 }
  0x6d   :  { %859 = vmatprep.subr.bf16.mxu0 %v1171_v0  ;;  %879 = vmatprep.subr.bf16.mxu1 %v1171_v0 }
  0x6e   :  { %833 = vmatprep.mubr.bf16.mxu0 %v1026_v21 }
  0x6f   :  { %880 = vmatpush3.bf16.msra.mxu1 %v1269_v5 }
  0x70   :  { %860 = vmatpush3.bf16.msra.mxu0 %v1269_v5  ;;  %881 = vmatprep.subr.bf16.mxu1 %v1171_v0 }
  0x71   :  { %861 = vmatprep.subr.bf16.mxu0 %v1171_v0 }
  0x73   :  { %882 = vmatpush3.bf16.msra.mxu1 %v1273_v7  ;;  %834 = vmatmul.mubr.bf16.gmra.mrb[4].mxu0 %v1027_v22 }
  0x74   :  { %862 = vmatpush3.bf16.msra.mxu0 %v1273_v7  ;;  %883 = vmatprep.subr.bf16.mxu1 %v1171_v0 }
  0x75   :  { %863 = vmatprep.subr.bf16.mxu0 %v1171_v0  ;;  %873 = vmatprep.mubr.msk.bf16.mxu0 %vm1172_vm0, %v1171_v0 }
  0x77   :  { %884 = vmatpush3.bf16.msra.mxu1 %v1277_v9 }
  0x78   :  { %864 = vmatpush3.bf16.msra.mxu0 %v1277_v9  ;;  %885 = vmatprep.subr.bf16.mxu1 %v1171_v0 }
  0x79   :  { %865 = vmatprep.subr.bf16.mxu0 %v1171_v0 }
  0x7b   :  { %886 = vmatpush3.bf16.msra.mxu1 %v1281_v12 }
  0x7c   :  { %866 = vmatpush3.bf16.msra.mxu0 %v1281_v12  ;;  %887 = vmatprep.subr.bf16.mxu1 %v1171_v0 }
  0x7d   :  { %867 = vmatprep.subr.bf16.mxu0 %v1171_v0 }
  0x7f   :  { %888 = vmatpush3.bf16.msra.mxu1 %v1285_v14 }
  0x80   :  { %868 = vmatpush3.bf16.msra.mxu0 %v1285_v14  ;;  %889 = vmatprep.subr.bf16.mxu1 %v1171_v0 }
  0x81   :  { %869 = vmatprep.subr.bf16.mxu0 %v1171_v0 }
  0x83   :  { %890 = vmatpush3.bf16.msra.mxu1 %v1289_v16 }
  0x84   :  { %870 = vmatpush3.bf16.msra.mxu0 %v1289_v16  ;;  %891 = vmatprep.subr.bf16.mxu1 %v1171_v0 }
  0x85   :  { %871 = vmatprep.subr.bf16.mxu0 %v1171_v0 }
  0x87   :  { %892 = vmatpush3.bf16.msra.mxu1 %v1293_v17 }
  0x88   :  { %872 = vmatpush3.bf16.msra.mxu0 %v1293_v17  ;;  %917 = vmatprep.subr.bf16.mxu1 %v1171_v0 }
  0x89   :  { %897 = vmatprep.subr.bf16.mxu0 %v1171_v0 }
 0x13d   :  { %v360_v28 = vpop.f32.mrb[0].mxu1 }
 0x13e   :  { %v1340_v24 = vpop.f32.mrb[0].mxu0  ;;  %v855_v30 = vpop.f32.mrb[1].mxu1 }
 0x13f   :  { %v220_v25 = vpop.f32.mrb[1].mxu0  ;;  %v363_v32 = vpop.f32.mrb[2].mxu1  ;;  %v229_v48 = vadd.f32 %v1340_v24, %v1338_v23 }
 0x140   :  { %v221_v26 = vadd.f32 %v1338_v23, %v220_v25  ;;  %v1343_v27 = vpop.f32.mrb[2].mxu0  ;;  %v856_v33 = vpop.f32.mrb[3].mxu1 }
 0x141   :  { %v223_v29 = vpop.f32.mrb[3].mxu0  ;;  %v232_v56 = vadd.f32 %v1343_v27, %v1338_v23 }
 0x142   :  { %v361_v31 = vadd.f32 %v360_v28, %v221_v26  ;;  %v224_v40 = vadd.f32 %v1338_v23, %v223_v29 }
 0x144   :  { %1028 = vtanh.f32 %v361_v31 }
 0x146   :  { %v1363_v36 = vpop.f32.mrb[4].mxu0 }
 0x147   :  { %v1365_v37 = vpop.f32.mrb[5].mxu0 }
 0x148   :  { %v1367_v38 = vpop.f32.mrb[6].mxu0  ;;  %v237_v1 = vadd.f32 %v1338_v23, %v1365_v37 }
 0x149   :  { %v1369_v39 = vpop.f32.mrb[7].mxu0  ;;  %v248_v25 = vadd.f32 %v1367_v38, %v1338_v23 }
 0x14e   :  { %v1029_v34 = vpop.eup %1028 }
 0x14f   :  { %367 = vst [vmem:[#allocation11] sm:$0xff] %v1029_v34  ;;  %v368_v35 = vpack.c.bf16 %v1029_v34, %v1029_v34 }
 0x151   :  { %874 = vmatmul.mubr.bf16.vlgmr.msra.gmra.mrb[8].mxu0 %v368_v35 }
 0x152   :  { %898 = vmatpush3.bf16.msra.mxu0 %v1266_v3  ;;  %913 = vmatprep.mubr.msk.bf16.mxu0 %vm1172_vm0, %v1171_v0 }
 0x153   :  { %899 = vmatprep.subr.bf16.mxu0 %v1171_v0 }
 0x156   :  { %900 = vmatpush3.bf16.msra.mxu0 %v1269_v5 }
 0x157   :  { %901 = vmatprep.subr.bf16.mxu0 %v1171_v0 }
 0x15a   :  { %902 = vmatpush3.bf16.msra.mxu0 %v1273_v7 }
 0x15b   :  { %903 = vmatprep.subr.bf16.mxu0 %v1171_v0 }
 0x15e   :  { %904 = vmatpush3.bf16.msra.mxu0 %v1277_v9 }
 0x15f   :  { %905 = vmatprep.subr.bf16.mxu0 %v1171_v0 }
 0x162   :  { %906 = vmatpush3.bf16.msra.mxu0 %v1281_v12 }
 0x163   :  { %907 = vmatprep.subr.bf16.mxu0 %v1171_v0 }
 0x166   :  { %908 = vmatpush3.bf16.msra.mxu0 %v1285_v14 }
 0x167   :  { %909 = vmatprep.subr.bf16.mxu0 %v1171_v0 }
 0x16a   :  { %910 = vmatpush3.bf16.msra.mxu0 %v1289_v16 }
 0x16b   :  { %911 = vmatprep.subr.bf16.mxu0 %v1171_v0 }
 0x16e   :  { %912 = vmatpush3.bf16.msra.mxu0 %v1293_v17 }
 0x16f   :  { %937 = vmatprep.subr.bf16.mxu0 %v1171_v0 }
 0x224   :  { %v405_v41 = vpop.f32.mrb[8].mxu0 }
 0x225   :  { %v406_v42 = vadd.f32 %v405_v41, %v224_v40  ;;  %v875_v43 = vpop.f32.mrb[9].mxu0 }
 0x226   :  { %v408_v44 = vpop.f32.mrb[10].mxu0 }
 0x227   :  { %1030 = vtanh.f32 %v406_v42  ;;  %v876_v45 = vpop.f32.mrb[11].mxu0 }
 0x231   :  { %v1031_v46 = vpop.eup %1030 }
 0x232   :  { %412 = vst [vmem:[#allocation11 + $0x8] sm:$0xff] %v1031_v46  ;;  %v413_v47 = vpack.c.bf16 %v1031_v46, %v1031_v46 }
 0x234   :  { %894 = vmatmul.mubr.bf16.vlgmr.msra.gmra.mrb[4].mxu1 %v413_v47 }
 0x235   :  { %918 = vmatpush3.bf16.msra.mxu1 %v1266_v3  ;;  %933 = vmatprep.mubr.msk.bf16.mxu1 %vm1172_vm0, %v1171_v0 }
 0x236   :  { %919 = vmatprep.subr.bf16.mxu1 %v1171_v0 }
 0x239   :  { %920 = vmatpush3.bf16.msra.mxu1 %v1269_v5 }
 0x23a   :  { %921 = vmatprep.subr.bf16.mxu1 %v1171_v0 }
 0x23d   :  { %922 = vmatpush3.bf16.msra.mxu1 %v1273_v7 }
 0x23e   :  { %923 = vmatprep.subr.bf16.mxu1 %v1171_v0 }
 0x241   :  { %924 = vmatpush3.bf16.msra.mxu1 %v1277_v9 }
 0x242   :  { %925 = vmatprep.subr.bf16.mxu1 %v1171_v0 }
 0x245   :  { %926 = vmatpush3.bf16.msra.mxu1 %v1281_v12 }
 0x246   :  { %927 = vmatprep.subr.bf16.mxu1 %v1171_v0 }
 0x249   :  { %928 = vmatpush3.bf16.msra.mxu1 %v1285_v14 }
 0x24a   :  { %929 = vmatprep.subr.bf16.mxu1 %v1171_v0 }
 0x24d   :  { %930 = vmatpush3.bf16.msra.mxu1 %v1289_v16 }
 0x24e   :  { %931 = vmatprep.subr.bf16.mxu1 %v1171_v0 }
 0x251   :  { %932 = vmatpush3.bf16.msra.mxu1 %v1293_v17 }
 0x252   :  { %957 = vmatprep.subr.bf16.mxu1 %v1171_v0 }
 0x307   :  { %v450_v49 = vpop.f32.mrb[4].mxu1 }
 0x308   :  { %v451_v50 = vadd.f32 %v450_v49, %v229_v48  ;;  %v895_v51 = vpop.f32.mrb[5].mxu1 }
 0x309   :  { %v453_v52 = vpop.f32.mrb[6].mxu1 }
 0x30a   :  { %1032 = vtanh.f32 %v451_v50  ;;  %v896_v53 = vpop.f32.mrb[7].mxu1 }
 0x314   :  { %v1033_v54 = vpop.eup %1032 }
 0x315   :  { %457 = vst [vmem:[#allocation11 + $0x10] sm:$0xff] %v1033_v54  ;;  %v458_v55 = vpack.c.bf16 %v1033_v54, %v1033_v54 }
 0x317   :  { %914 = vmatmul.mubr.bf16.vlgmr.msra.gmra.mrb[12].mxu0 %v458_v55 }
 0x318   :  { %938 = vmatpush3.bf16.msra.mxu0 %v1266_v3  ;;  %953 = vmatprep.mubr.msk.bf16.mxu0 %vm1172_vm0, %v1171_v0 }
 0x319   :  { %939 = vmatprep.subr.bf16.mxu0 %v1171_v0 }
 0x31c   :  { %940 = vmatpush3.bf16.msra.mxu0 %v1269_v5 }
 0x31d   :  { %941 = vmatprep.subr.bf16.mxu0 %v1171_v0 }
 0x320   :  { %942 = vmatpush3.bf16.msra.mxu0 %v1273_v7 }
 0x321   :  { %943 = vmatprep.subr.bf16.mxu0 %v1171_v0 }
 0x324   :  { %944 = vmatpush3.bf16.msra.mxu0 %v1277_v9 }
 0x325   :  { %945 = vmatprep.subr.bf16.mxu0 %v1171_v0 }
 0x328   :  { %946 = vmatpush3.bf16.msra.mxu0 %v1281_v12 }
 0x329   :  { %947 = vmatprep.subr.bf16.mxu0 %v1171_v0 }
 0x32c   :  { %948 = vmatpush3.bf16.msra.mxu0 %v1285_v14 }
 0x32d   :  { %949 = vmatprep.subr.bf16.mxu0 %v1171_v0 }
 0x330   :  { %950 = vmatpush3.bf16.msra.mxu0 %v1289_v16 }
 0x331   :  { %951 = vmatprep.subr.bf16.mxu0 %v1171_v0 }
 0x334   :  { %952 = vmatpush3.bf16.msra.mxu0 %v1293_v17 }
 0x335   :  { %977 = vmatprep.subr.bf16.mxu0 %v1171_v0 }
 0x3ea   :  { %v495_v57 = vpop.f32.mrb[12].mxu0 }
 0x3eb   :  { %v496_v58 = vadd.f32 %v495_v57, %v232_v56  ;;  %v915_v59 = vpop.f32.mrb[13].mxu0 }
 0x3ec   :  { %v498_v60 = vpop.f32.mrb[14].mxu0 }
 0x3ed   :  { %1034 = vtanh.f32 %v496_v58  ;;  %v916_v61 = vpop.f32.mrb[15].mxu0 }
 0x3f7   :  { %v1035_v62 = vpop.eup %1034 }
 0x3f8   :  { %502 = vst [vmem:[#allocation11 + $0x18] sm:$0xff] %v1035_v62  ;;  %v503_v63 = vpack.c.bf16 %v1035_v62, %v1035_v62 }
 0x3fa   :  { %934 = vmatmul.mubr.bf16.vlgmr.msra.gmra.mrb[8].mxu1 %v503_v63 }
 0x3fb   :  { %958 = vmatpush3.bf16.msra.mxu1 %v1266_v3  ;;  %973 = vmatprep.mubr.msk.bf16.mxu1 %vm1172_vm0, %v1171_v0 }
 0x3fc   :  { %959 = vmatprep.subr.bf16.mxu1 %v1171_v0 }
 0x3ff   :  { %960 = vmatpush3.bf16.msra.mxu1 %v1269_v5 }
 0x400   :  { %961 = vmatprep.subr.bf16.mxu1 %v1171_v0 }
 0x403   :  { %962 = vmatpush3.bf16.msra.mxu1 %v1273_v7 }
 0x404   :  { %963 = vmatprep.subr.bf16.mxu1 %v1171_v0 }
 0x407   :  { %964 = vmatpush3.bf16.msra.mxu1 %v1277_v9 }
 0x408   :  { %965 = vmatprep.subr.bf16.mxu1 %v1171_v0 }
 0x40b   :  { %966 = vmatpush3.bf16.msra.mxu1 %v1281_v12 }
 0x40c   :  { %967 = vmatprep.subr.bf16.mxu1 %v1171_v0 }
 0x40f   :  { %968 = vmatpush3.bf16.msra.mxu1 %v1285_v14 }
 0x410   :  { %969 = vmatprep.subr.bf16.mxu1 %v1171_v0 }
 0x413   :  { %970 = vmatpush3.bf16.msra.mxu1 %v1289_v16 }
 0x414   :  { %971 = vmatprep.subr.bf16.mxu1 %v1171_v0 }
 0x417   :  { %972 = vmatpush3.bf16.msra.mxu1 %v1293_v17 }
 0x4cd   :  { %v540_v2 = vpop.f32.mrb[8].mxu1 }
 0x4ce   :  { %v541_v4 = vadd.f32 %v540_v2, %v237_v1  ;;  %v935_v6 = vpop.f32.mrb[9].mxu1 }
 0x4cf   :  { %v543_v8 = vpop.f32.mrb[10].mxu1 }
 0x4d0   :  { %1036 = vtanh.f32 %v541_v4  ;;  %v936_v10 = vpop.f32.mrb[11].mxu1 }
 0x4da   :  { %v1037_v11 = vpop.eup %1036 }
 0x4db   :  { %547 = vst [vmem:[#allocation11 + $0x20] sm:$0xff] %v1037_v11  ;;  %v548_v13 = vpack.c.bf16 %v1037_v11, %v1037_v11 }
 0x4dd   :  { %954 = vmatmul.mubr.bf16.vlgmr.msra.gmra.mrb[16].mxu0 %v548_v13 }
 0x4de   :  { %978 = vmatpush3.bf16.msra.mxu0 %v1266_v3  ;;  %993 = vmatprep.mubr.msk.bf16.mxu0 %vm1172_vm0, %v1171_v0  ;;  %v240_v3 = vadd.f32 %v1338_v23, %v1369_v39 }
 0x4df   :  { %979 = vmatprep.subr.bf16.mxu0 %v1171_v0 }
 0x4e2   :  { %980 = vmatpush3.bf16.msra.mxu0 %v1269_v5 }
 0x4e3   :  { %981 = vmatprep.subr.bf16.mxu0 %v1171_v0 }
 0x4e6   :  { %982 = vmatpush3.bf16.msra.mxu0 %v1273_v7 }
 0x4e7   :  { %983 = vmatprep.subr.bf16.mxu0 %v1171_v0 }
 0x4ea   :  { %984 = vmatpush3.bf16.msra.mxu0 %v1277_v9 }
 0x4eb   :  { %985 = vmatprep.subr.bf16.mxu0 %v1171_v0 }
 0x4ee   :  { %986 = vmatpush3.bf16.msra.mxu0 %v1281_v12 }
 0x4ef   :  { %987 = vmatprep.subr.bf16.mxu0 %v1171_v0 }
 0x4f2   :  { %988 = vmatpush3.bf16.msra.mxu0 %v1285_v14 }
 0x4f3   :  { %989 = vmatprep.subr.bf16.mxu0 %v1171_v0 }
 0x4f6   :  { %990 = vmatpush3.bf16.msra.mxu0 %v1289_v16  ;;  %v245_v16 = vadd.f32 %v1363_v36, %v1338_v23 }
 0x4f7   :  { %991 = vmatprep.subr.bf16.mxu0 %v1171_v0 }
 0x4fa   :  { %992 = vmatpush3.bf16.msra.mxu0 %v1293_v17 }
 0x5b0   :  { %v585_v5 = vpop.f32.mrb[16].mxu0 }
 0x5b1   :  { %v586_v7 = vadd.f32 %v585_v5, %v240_v3  ;;  %v955_v9 = vpop.f32.mrb[17].mxu0 }
 0x5b2   :  { %v588_v15 = vpop.f32.mrb[18].mxu0 }
 0x5b3   :  { %1038 = vtanh.f32 %v586_v7  ;;  %v956_v12 = vpop.f32.mrb[19].mxu0 }
 0x5bd   :  { %v1039_v18 = vpop.eup %1038 }
 0x5be   :  { %592 = vst [vmem:[#allocation11 + $0x28] sm:$0xff] %v1039_v18  ;;  %v593_v14 = vpack.c.bf16 %v1039_v18, %v1039_v18 }
 0x5c0   :  { %974 = vmatmul.mubr.bf16.vlgmr.msra.gmra.mrb[12].mxu1 %v593_v14 }
 0x693   :  { %v630_v19 = vpop.f32.mrb[12].mxu1 }
 0x694   :  { %v631_v0 = vadd.f32 %v630_v19, %v245_v16  ;;  %v975_v20 = vpop.f32.mrb[13].mxu1 }
 0x695   :  { %v633_v17 = vpop.f32.mrb[14].mxu1 }
 0x696   :  { %1040 = vtanh.f32 %v631_v0  ;;  %v976_v21 = vpop.f32.mrb[15].mxu1 }
 0x6a0   :  { %v1041_v22 = vpop.eup %1040 }
 0x6a1   :  { %637 = vst [vmem:[#allocation11 + $0x30] sm:$0xff] %v1041_v22  ;;  %v638_v24 = vpack.c.bf16 %v1041_v22, %v1041_v22 }
 0x6a3   :  { %994 = vmatmul.mubr.bf16.vlgmr.msra.gmra.mrb[20].mxu0 %v638_v24 }
 0x776   :  { %v675_v26 = vpop.f32.mrb[20].mxu0 }
 0x777   :  { %v676_v27 = vadd.f32 %v675_v26, %v248_v25  ;;  %v995_v28 = vpop.f32.mrb[21].mxu0 }
 0x778   :  { %v678_v29 = vpop.f32.mrb[22].mxu0 }
 0x779   :  { %1042 = vtanh.f32 %v676_v27  ;;  %v996_v30 = vpop.f32.mrb[23].mxu0 }
 0x783   :  { %v1043_v31 = vpop.eup %1042 }
 0x784   :  { %682 = vst [vmem:[#allocation11 + $0x38] sm:$0xff] %v1043_v31 }
 0x785   :  { %1143 = shalt.err (!%p1140_p8)
}
 0x786   :  { %s1156_s22 = scalar_lea.hbm %s1468_s5, 2048  ;;  %p1147_p10 = scmp.lt.u32.totalorder %s707_s18, %s1468_s5 }
 0x787   :  { %p1145_p9 = scmp.ne.s32.totalorder %s707_s18, %s1156_s22  ;;  %p1148_p11 = scmp.lt.u32.totalorder %s1156_s22, %s1156_s22 }
 0x788   :  { %p1150_p13 = scmp.lt.u32.totalorder %s1156_s22, %s707_s18 }
 0x789   :  { %p1149_p12 = por %p1148_p11, %p1147_p10 }
 0x78b   :  { %p1151_p0 = por %p1150_p13, %p1149_p12 }
 0x78d   :  { %p1152_p1 = pnand %p1151_p0, %p1145_p9 }
 0x78f   :  { %1155 = shalt.err (!%p1152_p1)
}
 0x790   :  { %s1174_s25 = smov 128   ;;  %s1175_s26 = smov 8  }
 0x791   :  { %699 = dma.vmem_to_hbm [thread:$0]  %s694_s29, 1024, %s707_s18, [#allocation5], %s1174_s25, %s1174_s25, %s1175_s26  }
 0x792   :  { %1163 = dma.done.wait [#allocation5], 1024  }
 0x793   :  { %1164 = vsyncadd [#allocation5], 4294966272 }
 0x794   :  { %703 = vsyncpa [#allocation4], 1 }
 0x795   :  { %704 = vsyncpa [#allocation7], 1 }
 0x796   :  { %705 = vsyncpa [#allocation10], 1 }
 0x797   :  { %706 = vsyncpa [#allocation5], 1 }

</bundles_post_ra>
